<compile_context>
chip_gen: v7x
topology: tpu7x:2x2x1
jax: 0.10.0
libtpu: 0.0.40
codegen_flags: <defaults>
</compile_context>

<pallas_src>
import functools

import jax
import jax.numpy as jnp
from jax.experimental import pallas as pl
from jax.experimental.pallas import tpu as pltpu


# ---------------------------------------------------------------------------
# Kernel
# ---------------------------------------------------------------------------
def _hgblock_kernel(x_ref, w_m0_ref, b_m0_ref, w_mr_ref, b_mr_ref,
                    w_sc_ref, b_sc_ref, w_ec_ref, b_ec_ref, o_ref,
                    *, H, W, c1, cm, n, add):
    """Fused HGBlock for one batch element (spatial-flat lane-dense layout).

    x_ref   : (1, c1, H*W)         input (NCHW with H,W flattened)
    w_m0_ref: (cm, 9*c1)           m[0] 3x3 weights (im2col order, BN folded)
    b_m0_ref: (cm, 1)
    w_mr_ref: (n-1, cm, 9*cm)      m[1..n-1] 3x3 weights
    b_mr_ref: (n-1, cm, 1)
    w_sc_ref: (c2//2, c1 + n*cm)   sc 1x1 weights
    b_sc_ref: (c2//2, 1)
    w_ec_ref: (c2, c2//2)          ec 1x1 weights
    b_ec_ref: (c2, 1)
    o_ref   : (1, c2, H*W)
    """
    L = H * W
    P = W + 1            # flat halo: makes every 3x3 tap a static in-range slice

    x = x_ref[0]         # (c1, L) -- spatial on the lane axis

    # Column masks: taps with dx=+-1 must not read across a row boundary.
    col = jax.lax.broadcasted_iota(jnp.int32, (1, L), 1) % W
    ok_left = col > 0            # output position may read (h, w-1)
    ok_right = col < (W - 1)     # output position may read (h, w+1)

    def conv3x3_relu(a, w_flat, b):
        # a: (Cin, L), w_flat: (Cout, 9*Cin), b: (Cout, 1)
        cin = a.shape[0]
        halo = jnp.zeros((cin, P), a.dtype)
        ap = jnp.concatenate([halo, a, halo], axis=1)       # (Cin, L + 2P)
        taps = []
        for ky in range(3):
            for kx in range(3):
                dy, dx = ky - 1, kx - 1
                s = P + dy * W + dx
                t = ap[:, s:s + L]                          # (Cin, L)
                if dx == 1:
                    t = jnp.where(ok_right, t, 0.0)
                elif dx == -1:
                    t = jnp.where(ok_left, t, 0.0)
                taps.append(t)
        xcol = jnp.concatenate(taps, axis=0)                # (9*Cin, L) im2col
        y = jnp.dot(w_flat, xcol, preferred_element_type=jnp.float32) + b
        return jnp.maximum(y, 0.0)                          # ReLU

    # sc (1x1 conv over the channel concat), accumulated branch by branch:
    # accumulator is initialised with bias + x's contribution (no zero fill).
    w_sc = w_sc_ref[...]                                    # (c2//2, c1 + n*cm)
    sc_acc = (jnp.dot(w_sc[:, :c1], x, preferred_element_type=jnp.float32)
              + b_sc_ref[...])

    cur = conv3x3_relu(x, w_m0_ref[...], b_m0_ref[...])     # (cm, L)
    sc_acc = sc_acc + jnp.dot(w_sc[:, c1:c1 + cm], cur,
                              preferred_element_type=jnp.float32)

    w_mr = w_mr_ref[...]                                    # (n-1, cm, 9*cm)
    b_mr = b_mr_ref[...]                                    # (n-1, cm, 1)
    for i in range(n - 1):
        cur = conv3x3_relu(cur, w_mr[i], b_mr[i])
        off = c1 + (i + 1) * cm
        sc_acc = sc_acc + jnp.dot(w_sc[:, off:off + cm], cur,
                                  preferred_element_type=jnp.float32)

    sc = jnp.maximum(sc_acc, 0.0)                           # (c2//2, L)
    ec = (jnp.dot(w_ec_ref[...], sc, preferred_element_type=jnp.float32)
          + b_ec_ref[...])
    ec = jnp.maximum(ec, 0.0)                               # (c2, L)
    if add:
        ec = ec + x                                         # shortcut (c1 == c2)
    o_ref[...] = ec[None]


# ---------------------------------------------------------------------------
# Wrapper
# ---------------------------------------------------------------------------
def _im2col_weight(w_oihw):
    """(Cout, Cin, kh, kw) -> (Cout, kh*kw*Cin), tap-major / channel-minor."""
    co, ci, kh, kw = w_oihw.shape
    return jnp.transpose(w_oihw, (0, 2, 3, 1)).reshape(co, kh * kw * ci)


def hgblock_pallas(x, ws_m, bs_m, w_sc, b_sc, w_ec, b_ec, *, add=False):
    """x: (N, c1, H, W) f32 NCHW.  Weights are BN-folded OIHW, biases 1-D."""
    N, c1, H, W = x.shape
    n = len(ws_m)
    assert n >= 2, "kernel expects n >= 2 blocks (HGBlock default is n=6)"
    assert tuple(ws_m[0].shape[2:]) == (3, 3), "kernel implements the default k=3"
    cm = ws_m[0].shape[0]
    c_sc = w_sc.shape[0]
    c2 = w_ec.shape[0]
    L = H * W

    # Repack weights for the kernel (tiny arrays, negligible work).
    w_m0 = _im2col_weight(ws_m[0])                              # (cm, 9*c1)
    b_m0 = bs_m[0].reshape(cm, 1)
    w_mr = jnp.stack([_im2col_weight(w) for w in ws_m[1:]])     # (n-1, cm, 9*cm)
    b_mr = jnp.stack([b.reshape(cm, 1) for b in bs_m[1:]])      # (n-1, cm, 1)
    w_sc2 = w_sc.reshape(c_sc, c1 + n * cm)
    b_sc2 = b_sc.reshape(c_sc, 1)
    w_ec2 = w_ec.reshape(c2, c_sc)
    b_ec2 = b_ec.reshape(c2, 1)

    x_flat = x.reshape(N, c1, L)    # free reshape: NCHW is already spatial-last

    kernel = functools.partial(_hgblock_kernel,
                               H=H, W=W, c1=c1, cm=cm, n=n, add=add)

    out_flat = pl.pallas_call(
        kernel,
        out_shape=jax.ShapeDtypeStruct((N, c2, L), jnp.float32),
        grid_spec=pltpu.PrefetchScalarGridSpec(
            num_scalar_prefetch=0,
            grid=(N,),
            in_specs=[
                pl.BlockSpec((1, c1, L), lambda b: (b, 0, 0)),
                pl.BlockSpec(w_m0.shape, lambda b: (0, 0)),
                pl.BlockSpec(b_m0.shape, lambda b: (0, 0)),
                pl.BlockSpec(w_mr.shape, lambda b: (0, 0, 0)),
                pl.BlockSpec(b_mr.shape, lambda b: (0, 0, 0)),
                pl.BlockSpec(w_sc2.shape, lambda b: (0, 0)),
                pl.BlockSpec(b_sc2.shape, lambda b: (0, 0)),
                pl.BlockSpec(w_ec2.shape, lambda b: (0, 0)),
                pl.BlockSpec(b_ec2.shape, lambda b: (0, 0)),
            ],
            out_specs=pl.BlockSpec((1, c2, L), lambda b: (b, 0, 0)),
        ),
        # Batch axis is embarrassingly parallel -> v7x's 2 TensorCores split it.
        compiler_params=pltpu.CompilerParams(
            dimension_semantics=("parallel",)),
    )(x_flat, w_m0, b_m0, w_mr, b_mr, w_sc2, b_sc2, w_ec2, b_ec2)

    return out_flat.reshape(N, c2, H, W)


# ---------------------------------------------------------------------------
# BN folding + pure-JAX reference
# ---------------------------------------------------------------------------
def _fold_bn(w_oihw, gamma, beta, mean, var, eps=1e-3):
    """Fold BatchNorm2d into the (bias-free) conv. ultralytics BN uses eps=1e-3."""
    scale = gamma / jnp.sqrt(var + eps)
    w_f = w_oihw * scale[:, None, None, None]
    b_f = beta - mean * scale
    return w_f, b_f


def _make_folded_conv(key, cin, cout, k):
    kw, kg, kb, km, kv = jax.random.split(key, 5)
    w = 0.1 * jax.random.normal(kw, (cout, cin, k, k), jnp.float32)
    gamma = 1.0 + 0.1 * jax.random.normal(kg, (cout,), jnp.float32)
    beta = 0.1 * jax.random.normal(kb, (cout,), jnp.float32)
    mean = 0.1 * jax.random.normal(km, (cout,), jnp.float32)
    var = jnp.abs(jax.random.normal(kv, (cout,), jnp.float32)) + 0.5
    return _fold_bn(w, gamma, beta, mean, var)


def _conv_bn_relu_ref(x, w_oihw, b, pad):
    y = jax.lax.conv_general_dilated(
        x, w_oihw, window_strides=(1, 1), padding=((pad, pad), (pad, pad)),
        dimension_numbers=("NCHW", "OIHW", "NCHW"))
    y = y + b[None, :, None, None]
    return jnp.maximum(y, 0.0)


def reference_hgblock(x, ws_m, bs_m, w_sc, b_sc, w_ec, b_ec, *, add=False):
    y = [x]
    for w, b in zip(ws_m, bs_m):
        y.append(_conv_bn_relu_ref(y[-1], w, b, pad=1))
    cat = jnp.concatenate(y, axis=1)
    s = _conv_bn_relu_ref(cat, w_sc, b_sc, pad=0)
    e = _conv_bn_relu_ref(s, w_ec, b_ec, pad=0)
    return e + x if add else e


# ---------------------------------------------------------------------------
# Test
# ---------------------------------------------------------------------------
if __name__ == "__main__":
    # HGBlock(c1=4, cm=6, c2=8, k=3, n=6, lightconv=False, shortcut=False, act=ReLU)
    c1, cm, c2, n, k = 4, 6, 8, 6, 3
    N, H, W = 2, 16, 16
    shortcut = False                 # module default
    add = shortcut and c1 == c2

    key = jax.random.PRNGKey(0)
    keys = jax.random.split(key, n + 3)

    x = jax.random.normal(keys[0], (N, c1, H, W), dtype=jnp.float32)

    ws_m, bs_m = [], []
    for i in range(n):
        w, b = _make_folded_conv(keys[1 + i], c1 if i == 0 else cm, cm, k)
        ws_m.append(w)
        bs_m.append(b)
    w_sc, b_sc = _make_folded_conv(keys[n + 1], c1 + n * cm, c2 // 2, 1)
    w_ec, b_ec = _make_folded_conv(keys[n + 2], c2 // 2, c2, 1)

    out = hgblock_pallas(x, ws_m, bs_m, w_sc, b_sc, w_ec, b_ec, add=add)
    out = jax.block_until_ready(out)

    ref = reference_hgblock(x, ws_m, bs_m, w_sc, b_sc, w_ec, b_ec, add=add)
    assert out.shape == (N, c2, H, W)
    err = float(jnp.max(jnp.abs(out - ref)))
    assert err < 1e-3, f"mismatch vs JAX reference, max abs err={err}"

    print("KERNEL_OK")
</pallas_src>

<mosaic_0001>
module attributes {stable_mosaic.version = 11 : i64} {
  func.func @_hgblock_kernel(%arg0: i32, %arg1: memref<1x4x256xf32, #tpu.memory_space<vmem>>, %arg2: memref<6x36xf32, #tpu.memory_space<vmem>>, %arg3: memref<6x1xf32, #tpu.memory_space<vmem>>, %arg4: memref<5x6x54xf32, #tpu.memory_space<vmem>>, %arg5: memref<5x6x1xf32, #tpu.memory_space<vmem>>, %arg6: memref<4x40xf32, #tpu.memory_space<vmem>>, %arg7: memref<4x1xf32, #tpu.memory_space<vmem>>, %arg8: memref<8x4xf32, #tpu.memory_space<vmem>>, %arg9: memref<8x1xf32, #tpu.memory_space<vmem>>, %arg10: memref<1x8x256xf32, #tpu.memory_space<vmem>>) attributes {dimension_semantics = [#tpu.dimension_semantics<parallel>], iteration_bounds = array<i64: 2>, scalar_prefetch = 0 : i64, scratch_operands = 0 : i64, tpu.core_type = #tpu.core_type<tc>, window_params = [{transform_indices = @transform_0, window_bounds = array<i64: 1, 4, 256>}, {pipeline_mode = #tpu.pipeline_mode<synchronous>, transform_indices = @transform_1, window_bounds = array<i64: 6, 36>}, {pipeline_mode = #tpu.pipeline_mode<synchronous>, transform_indices = @transform_2, window_bounds = array<i64: 6, 1>}, {pipeline_mode = #tpu.pipeline_mode<synchronous>, transform_indices = @transform_3, window_bounds = array<i64: 5, 6, 54>}, {pipeline_mode = #tpu.pipeline_mode<synchronous>, transform_indices = @transform_4, window_bounds = array<i64: 5, 6, 1>}, {pipeline_mode = #tpu.pipeline_mode<synchronous>, transform_indices = @transform_5, window_bounds = array<i64: 4, 40>}, {pipeline_mode = #tpu.pipeline_mode<synchronous>, transform_indices = @transform_6, window_bounds = array<i64: 4, 1>}, {pipeline_mode = #tpu.pipeline_mode<synchronous>, transform_indices = @transform_7, window_bounds = array<i64: 8, 4>}, {pipeline_mode = #tpu.pipeline_mode<synchronous>, transform_indices = @transform_8, window_bounds = array<i64: 8, 1>}, {transform_indices = @transform_9, window_bounds = array<i64: 1, 8, 256>}]} {
    %c0 = arith.constant 0 : index
    %c0_0 = arith.constant 0 : index
    %c0_1 = arith.constant 0 : index
    %0 = vector.load %arg1[%c0, %c0_0, %c0_1] : memref<1x4x256xf32, #tpu.memory_space<vmem>>, vector<1x4x256xf32>
    %1 = vector.shape_cast %0 : vector<1x4x256xf32> to vector<4x256xf32>
    %2 = tpu.iota {dimensions = array<i32: 1>} : vector<1x256xi32>
    %c16_i32 = arith.constant 16 : i32
    %c0_i32 = arith.constant 0 : i32
    %3 = arith.cmpi eq, %c16_i32, %c0_i32 : i32
    %c1_i32 = arith.constant 1 : i32
    %4 = arith.select %3, %c1_i32, %c16_i32 : i32
    %5 = vector.broadcast %4 : i32 to vector<1x256xi32>
    %6 = arith.remsi %2, %5 : vector<1x256xi32>
    %c0_i32_2 = arith.constant 0 : i32
    %7 = vector.broadcast %c0_i32_2 : i32 to vector<1x256xi32>
    %8 = arith.cmpi ne, %6, %7 : vector<1x256xi32>
    %c0_i32_3 = arith.constant 0 : i32
    %9 = vector.broadcast %c0_i32_3 : i32 to vector<1x256xi32>
    %10 = arith.cmpi slt, %6, %9 : vector<1x256xi32>
    %c0_i32_4 = arith.constant 0 : i32
    %11 = arith.cmpi slt, %4, %c0_i32_4 : i32
    %12 = vector.broadcast %11 : i1 to vector<1x256xi1>
    %13 = vector.broadcast %12 : vector<1x256xi1> to vector<1x256xi1>
    %14 = arith.xori %10, %13 : vector<1x256xi1>
    %15 = arith.andi %14, %8 : vector<1x256xi1>
    %16 = vector.broadcast %4 : i32 to vector<1x256xi32>
    %17 = arith.addi %6, %16 : vector<1x256xi32>
    %18 = arith.select %15, %17, %6 : vector<1x256xi1>, vector<1x256xi32>
    %c0_i32_5 = arith.constant 0 : i32
    %19 = vector.broadcast %c0_i32_5 : i32 to vector<1x256xi32>
    %20 = arith.cmpi sgt, %18, %19 : vector<1x256xi32>
    %c15_i32 = arith.constant 15 : i32
    %21 = vector.broadcast %c15_i32 : i32 to vector<1x256xi32>
    %22 = arith.cmpi slt, %18, %21 : vector<1x256xi32>
    %c0_6 = arith.constant 0 : index
    %c0_7 = arith.constant 0 : index
    %23 = vector.load %arg6[%c0_6, %c0_7] : memref<4x40xf32, #tpu.memory_space<vmem>>, vector<4x40xf32>
    %24 = vector.extract_strided_slice %23 {offsets = [0, 0], sizes = [4, 4], strides = [1, 1]} : vector<4x40xf32> to vector<4x4xf32>
    %cst = arith.constant dense<0.000000e+00> : vector<4x256xf32>
    %25 = tpu.matmul %24, %1, %cst {dimension_numbers = #tpu.dot_dimension_numbers<[1], [0], [0], [1], [0, 0, 1, 1], [], []>} : vector<4x4xf32>, vector<4x256xf32>, vector<4x256xf32> -> vector<4x256xf32>
    %c0_8 = arith.constant 0 : index
    %c0_9 = arith.constant 0 : index
    %26 = vector.load %arg7[%c0_8, %c0_9] : memref<4x1xf32, #tpu.memory_space<vmem>>, vector<4x1xf32>
    %27 = vector.broadcast %26 : vector<4x1xf32> to vector<4x256xf32>
    %28 = arith.addf %25, %27 : vector<4x256xf32>
    %c0_10 = arith.constant 0 : index
    %c0_11 = arith.constant 0 : index
    %29 = vector.load %arg2[%c0_10, %c0_11] : memref<6x36xf32, #tpu.memory_space<vmem>>, vector<6x36xf32>
    %c0_12 = arith.constant 0 : index
    %c0_13 = arith.constant 0 : index
    %30 = vector.load %arg3[%c0_12, %c0_13] : memref<6x1xf32, #tpu.memory_space<vmem>>, vector<6x1xf32>
    %cst_14 = arith.constant 0.000000e+00 : f32
    %31 = vector.broadcast %cst_14 : f32 to vector<4x17xf32>
    %32 = tpu.concatenate %31, %1, %31 in 1 : vector<4x17xf32>, vector<4x256xf32>, vector<4x17xf32> -> vector<4x290xf32>
    %33 = vector.extract_strided_slice %32 {offsets = [0, 0], sizes = [4, 256], strides = [1, 1]} : vector<4x290xf32> to vector<4x256xf32>
    %cst_15 = arith.constant 0.000000e+00 : f32
    %34 = vector.shape_cast %20 : vector<1x256xi1> to vector<1x256xi1>
    %35 = vector.broadcast %34 : vector<1x256xi1> to vector<4x256xi1>
    %36 = vector.broadcast %cst_15 : f32 to vector<4x256xf32>
    %37 = arith.select %35, %33, %36 : vector<4x256xi1>, vector<4x256xf32>
    %38 = vector.extract_strided_slice %32 {offsets = [0, 1], sizes = [4, 256], strides = [1, 1]} : vector<4x290xf32> to vector<4x256xf32>
    %39 = vector.extract_strided_slice %32 {offsets = [0, 2], sizes = [4, 256], strides = [1, 1]} : vector<4x290xf32> to vector<4x256xf32>
    %cst_16 = arith.constant 0.000000e+00 : f32
    %40 = vector.shape_cast %22 : vector<1x256xi1> to vector<1x256xi1>
    %41 = vector.broadcast %40 : vector<1x256xi1> to vector<4x256xi1>
    %42 = vector.broadcast %cst_16 : f32 to vector<4x256xf32>
    %43 = arith.select %41, %39, %42 : vector<4x256xi1>, vector<4x256xf32>
    %44 = vector.extract_strided_slice %32 {offsets = [0, 16], sizes = [4, 256], strides = [1, 1]} : vector<4x290xf32> to vector<4x256xf32>
    %cst_17 = arith.constant 0.000000e+00 : f32
    %45 = vector.shape_cast %20 : vector<1x256xi1> to vector<1x256xi1>
    %46 = vector.broadcast %45 : vector<1x256xi1> to vector<4x256xi1>
    %47 = vector.broadcast %cst_17 : f32 to vector<4x256xf32>
    %48 = arith.select %46, %44, %47 : vector<4x256xi1>, vector<4x256xf32>
    %49 = vector.extract_strided_slice %32 {offsets = [0, 17], sizes = [4, 256], strides = [1, 1]} : vector<4x290xf32> to vector<4x256xf32>
    %50 = vector.extract_strided_slice %32 {offsets = [0, 18], sizes = [4, 256], strides = [1, 1]} : vector<4x290xf32> to vector<4x256xf32>
    %cst_18 = arith.constant 0.000000e+00 : f32
    %51 = vector.shape_cast %22 : vector<1x256xi1> to vector<1x256xi1>
    %52 = vector.broadcast %51 : vector<1x256xi1> to vector<4x256xi1>
    %53 = vector.broadcast %cst_18 : f32 to vector<4x256xf32>
    %54 = arith.select %52, %50, %53 : vector<4x256xi1>, vector<4x256xf32>
    %55 = vector.extract_strided_slice %32 {offsets = [0, 32], sizes = [4, 256], strides = [1, 1]} : vector<4x290xf32> to vector<4x256xf32>
    %cst_19 = arith.constant 0.000000e+00 : f32
    %56 = vector.shape_cast %20 : vector<1x256xi1> to vector<1x256xi1>
    %57 = vector.broadcast %56 : vector<1x256xi1> to vector<4x256xi1>
    %58 = vector.broadcast %cst_19 : f32 to vector<4x256xf32>
    %59 = arith.select %57, %55, %58 : vector<4x256xi1>, vector<4x256xf32>
    %60 = vector.extract_strided_slice %32 {offsets = [0, 33], sizes = [4, 256], strides = [1, 1]} : vector<4x290xf32> to vector<4x256xf32>
    %61 = vector.extract_strided_slice %32 {offsets = [0, 34], sizes = [4, 256], strides = [1, 1]} : vector<4x290xf32> to vector<4x256xf32>
    %cst_20 = arith.constant 0.000000e+00 : f32
    %62 = vector.shape_cast %22 : vector<1x256xi1> to vector<1x256xi1>
    %63 = vector.broadcast %62 : vector<1x256xi1> to vector<4x256xi1>
    %64 = vector.broadcast %cst_20 : f32 to vector<4x256xf32>
    %65 = arith.select %63, %61, %64 : vector<4x256xi1>, vector<4x256xf32>
    %66 = tpu.concatenate %37, %38, %43, %48, %49, %54, %59, %60, %65 in 0 : vector<4x256xf32>, vector<4x256xf32>, vector<4x256xf32>, vector<4x256xf32>, vector<4x256xf32>, vector<4x256xf32>, vector<4x256xf32>, vector<4x256xf32>, vector<4x256xf32> -> vector<36x256xf32>
    %cst_21 = arith.constant dense<0.000000e+00> : vector<6x256xf32>
    %67 = tpu.matmul %29, %66, %cst_21 {dimension_numbers = #tpu.dot_dimension_numbers<[1], [0], [0], [1], [0, 0, 1, 1], [], []>} : vector<6x36xf32>, vector<36x256xf32>, vector<6x256xf32> -> vector<6x256xf32>
    %68 = vector.broadcast %30 : vector<6x1xf32> to vector<6x256xf32>
    %69 = arith.addf %67, %68 : vector<6x256xf32>
    %cst_22 = arith.constant 0.000000e+00 : f32
    %70 = vector.broadcast %cst_22 : f32 to vector<6x256xf32>
    %71 = arith.maximumf %69, %70 : vector<6x256xf32>
    %72 = vector.extract_strided_slice %23 {offsets = [0, 4], sizes = [4, 6], strides = [1, 1]} : vector<4x40xf32> to vector<4x6xf32>
    %cst_23 = arith.constant dense<0.000000e+00> : vector<4x256xf32>
    %73 = tpu.matmul %72, %71, %cst_23 {dimension_numbers = #tpu.dot_dimension_numbers<[1], [0], [0], [1], [0, 0, 1, 1], [], []>} : vector<4x6xf32>, vector<6x256xf32>, vector<4x256xf32> -> vector<4x256xf32>
    %74 = arith.addf %28, %73 : vector<4x256xf32>
    %c0_24 = arith.constant 0 : index
    %c0_25 = arith.constant 0 : index
    %c0_26 = arith.constant 0 : index
    %75 = vector.load %arg4[%c0_24, %c0_25, %c0_26] : memref<5x6x54xf32, #tpu.memory_space<vmem>>, vector<5x6x54xf32>
    %c0_27 = arith.constant 0 : index
    %c0_28 = arith.constant 0 : index
    %c0_29 = arith.constant 0 : index
    %76 = vector.load %arg5[%c0_27, %c0_28, %c0_29] : memref<5x6x1xf32, #tpu.memory_space<vmem>>, vector<5x6x1xf32>
    %77 = vector.extract_strided_slice %75 {offsets = [0, 0, 0], sizes = [1, 6, 54], strides = [1, 1, 1]} : vector<5x6x54xf32> to vector<1x6x54xf32>
    %78 = vector.shape_cast %77 : vector<1x6x54xf32> to vector<6x54xf32>
    %79 = vector.extract_strided_slice %76 {offsets = [0, 0, 0], sizes = [1, 6, 1], strides = [1, 1, 1]} : vector<5x6x1xf32> to vector<1x6x1xf32>
    %80 = vector.shape_cast %79 : vector<1x6x1xf32> to vector<6x1xf32>
    %cst_30 = arith.constant 0.000000e+00 : f32
    %81 = vector.broadcast %cst_30 : f32 to vector<6x17xf32>
    %82 = tpu.concatenate %81, %71, %81 in 1 : vector<6x17xf32>, vector<6x256xf32>, vector<6x17xf32> -> vector<6x290xf32>
    %83 = vector.extract_strided_slice %82 {offsets = [0, 0], sizes = [6, 256], strides = [1, 1]} : vector<6x290xf32> to vector<6x256xf32>
    %cst_31 = arith.constant 0.000000e+00 : f32
    %84 = vector.shape_cast %20 : vector<1x256xi1> to vector<1x256xi1>
    %85 = vector.broadcast %84 : vector<1x256xi1> to vector<6x256xi1>
    %86 = vector.broadcast %cst_31 : f32 to vector<6x256xf32>
    %87 = arith.select %85, %83, %86 : vector<6x256xi1>, vector<6x256xf32>
    %88 = vector.extract_strided_slice %82 {offsets = [0, 1], sizes = [6, 256], strides = [1, 1]} : vector<6x290xf32> to vector<6x256xf32>
    %89 = vector.extract_strided_slice %82 {offsets = [0, 2], sizes = [6, 256], strides = [1, 1]} : vector<6x290xf32> to vector<6x256xf32>
    %cst_32 = arith.constant 0.000000e+00 : f32
    %90 = vector.shape_cast %22 : vector<1x256xi1> to vector<1x256xi1>
    %91 = vector.broadcast %90 : vector<1x256xi1> to vector<6x256xi1>
    %92 = vector.broadcast %cst_32 : f32 to vector<6x256xf32>
    %93 = arith.select %91, %89, %92 : vector<6x256xi1>, vector<6x256xf32>
    %94 = vector.extract_strided_slice %82 {offsets = [0, 16], sizes = [6, 256], strides = [1, 1]} : vector<6x290xf32> to vector<6x256xf32>
    %cst_33 = arith.constant 0.000000e+00 : f32
    %95 = vector.shape_cast %20 : vector<1x256xi1> to vector<1x256xi1>
    %96 = vector.broadcast %95 : vector<1x256xi1> to vector<6x256xi1>
    %97 = vector.broadcast %cst_33 : f32 to vector<6x256xf32>
    %98 = arith.select %96, %94, %97 : vector<6x256xi1>, vector<6x256xf32>
    %99 = vector.extract_strided_slice %82 {offsets = [0, 17], sizes = [6, 256], strides = [1, 1]} : vector<6x290xf32> to vector<6x256xf32>
    %100 = vector.extract_strided_slice %82 {offsets = [0, 18], sizes = [6, 256], strides = [1, 1]} : vector<6x290xf32> to vector<6x256xf32>
    %cst_34 = arith.constant 0.000000e+00 : f32
    %101 = vector.shape_cast %22 : vector<1x256xi1> to vector<1x256xi1>
    %102 = vector.broadcast %101 : vector<1x256xi1> to vector<6x256xi1>
    %103 = vector.broadcast %cst_34 : f32 to vector<6x256xf32>
    %104 = arith.select %102, %100, %103 : vector<6x256xi1>, vector<6x256xf32>
    %105 = vector.extract_strided_slice %82 {offsets = [0, 32], sizes = [6, 256], strides = [1, 1]} : vector<6x290xf32> to vector<6x256xf32>
    %cst_35 = arith.constant 0.000000e+00 : f32
    %106 = vector.shape_cast %20 : vector<1x256xi1> to vector<1x256xi1>
    %107 = vector.broadcast %106 : vector<1x256xi1> to vector<6x256xi1>
    %108 = vector.broadcast %cst_35 : f32 to vector<6x256xf32>
    %109 = arith.select %107, %105, %108 : vector<6x256xi1>, vector<6x256xf32>
    %110 = vector.extract_strided_slice %82 {offsets = [0, 33], sizes = [6, 256], strides = [1, 1]} : vector<6x290xf32> to vector<6x256xf32>
    %111 = vector.extract_strided_slice %82 {offsets = [0, 34], sizes = [6, 256], strides = [1, 1]} : vector<6x290xf32> to vector<6x256xf32>
    %cst_36 = arith.constant 0.000000e+00 : f32
    %112 = vector.shape_cast %22 : vector<1x256xi1> to vector<1x256xi1>
    %113 = vector.broadcast %112 : vector<1x256xi1> to vector<6x256xi1>
    %114 = vector.broadcast %cst_36 : f32 to vector<6x256xf32>
    %115 = arith.select %113, %111, %114 : vector<6x256xi1>, vector<6x256xf32>
    %116 = tpu.concatenate %87, %88, %93, %98, %99, %104, %109, %110, %115 in 0 : vector<6x256xf32>, vector<6x256xf32>, vector<6x256xf32>, vector<6x256xf32>, vector<6x256xf32>, vector<6x256xf32>, vector<6x256xf32>, vector<6x256xf32>, vector<6x256xf32> -> vector<54x256xf32>
    %cst_37 = arith.constant dense<0.000000e+00> : vector<6x256xf32>
    %117 = tpu.matmul %78, %116, %cst_37 {dimension_numbers = #tpu.dot_dimension_numbers<[1], [0], [0], [1], [0, 0, 1, 1], [], []>} : vector<6x54xf32>, vector<54x256xf32>, vector<6x256xf32> -> vector<6x256xf32>
    %118 = vector.broadcast %80 : vector<6x1xf32> to vector<6x256xf32>
    %119 = arith.addf %117, %118 : vector<6x256xf32>
    %cst_38 = arith.constant 0.000000e+00 : f32
    %120 = vector.broadcast %cst_38 : f32 to vector<6x256xf32>
    %121 = arith.maximumf %119, %120 : vector<6x256xf32>
    %122 = vector.extract_strided_slice %23 {offsets = [0, 10], sizes = [4, 6], strides = [1, 1]} : vector<4x40xf32> to vector<4x6xf32>
    %cst_39 = arith.constant dense<0.000000e+00> : vector<4x256xf32>
    %123 = tpu.matmul %122, %121, %cst_39 {dimension_numbers = #tpu.dot_dimension_numbers<[1], [0], [0], [1], [0, 0, 1, 1], [], []>} : vector<4x6xf32>, vector<6x256xf32>, vector<4x256xf32> -> vector<4x256xf32>
    %124 = arith.addf %74, %123 : vector<4x256xf32>
    %125 = vector.extract_strided_slice %75 {offsets = [1, 0, 0], sizes = [1, 6, 54], strides = [1, 1, 1]} : vector<5x6x54xf32> to vector<1x6x54xf32>
    %126 = vector.shape_cast %125 : vector<1x6x54xf32> to vector<6x54xf32>
    %127 = vector.extract_strided_slice %76 {offsets = [1, 0, 0], sizes = [1, 6, 1], strides = [1, 1, 1]} : vector<5x6x1xf32> to vector<1x6x1xf32>
    %128 = vector.shape_cast %127 : vector<1x6x1xf32> to vector<6x1xf32>
    %cst_40 = arith.constant 0.000000e+00 : f32
    %129 = vector.broadcast %cst_40 : f32 to vector<6x17xf32>
    %130 = tpu.concatenate %129, %121, %129 in 1 : vector<6x17xf32>, vector<6x256xf32>, vector<6x17xf32> -> vector<6x290xf32>
    %131 = vector.extract_strided_slice %130 {offsets = [0, 0], sizes = [6, 256], strides = [1, 1]} : vector<6x290xf32> to vector<6x256xf32>
    %cst_41 = arith.constant 0.000000e+00 : f32
    %132 = vector.shape_cast %20 : vector<1x256xi1> to vector<1x256xi1>
    %133 = vector.broadcast %132 : vector<1x256xi1> to vector<6x256xi1>
    %134 = vector.broadcast %cst_41 : f32 to vector<6x256xf32>
    %135 = arith.select %133, %131, %134 : vector<6x256xi1>, vector<6x256xf32>
    %136 = vector.extract_strided_slice %130 {offsets = [0, 1], sizes = [6, 256], strides = [1, 1]} : vector<6x290xf32> to vector<6x256xf32>
    %137 = vector.extract_strided_slice %130 {offsets = [0, 2], sizes = [6, 256], strides = [1, 1]} : vector<6x290xf32> to vector<6x256xf32>
    %cst_42 = arith.constant 0.000000e+00 : f32
    %138 = vector.shape_cast %22 : vector<1x256xi1> to vector<1x256xi1>
    %139 = vector.broadcast %138 : vector<1x256xi1> to vector<6x256xi1>
    %140 = vector.broadcast %cst_42 : f32 to vector<6x256xf32>
    %141 = arith.select %139, %137, %140 : vector<6x256xi1>, vector<6x256xf32>
    %142 = vector.extract_strided_slice %130 {offsets = [0, 16], sizes = [6, 256], strides = [1, 1]} : vector<6x290xf32> to vector<6x256xf32>
    %cst_43 = arith.constant 0.000000e+00 : f32
    %143 = vector.shape_cast %20 : vector<1x256xi1> to vector<1x256xi1>
    %144 = vector.broadcast %143 : vector<1x256xi1> to vector<6x256xi1>
    %145 = vector.broadcast %cst_43 : f32 to vector<6x256xf32>
    %146 = arith.select %144, %142, %145 : vector<6x256xi1>, vector<6x256xf32>
    %147 = vector.extract_strided_slice %130 {offsets = [0, 17], sizes = [6, 256], strides = [1, 1]} : vector<6x290xf32> to vector<6x256xf32>
    %148 = vector.extract_strided_slice %130 {offsets = [0, 18], sizes = [6, 256], strides = [1, 1]} : vector<6x290xf32> to vector<6x256xf32>
    %cst_44 = arith.constant 0.000000e+00 : f32
    %149 = vector.shape_cast %22 : vector<1x256xi1> to vector<1x256xi1>
    %150 = vector.broadcast %149 : vector<1x256xi1> to vector<6x256xi1>
    %151 = vector.broadcast %cst_44 : f32 to vector<6x256xf32>
    %152 = arith.select %150, %148, %151 : vector<6x256xi1>, vector<6x256xf32>
    %153 = vector.extract_strided_slice %130 {offsets = [0, 32], sizes = [6, 256], strides = [1, 1]} : vector<6x290xf32> to vector<6x256xf32>
    %cst_45 = arith.constant 0.000000e+00 : f32
    %154 = vector.shape_cast %20 : vector<1x256xi1> to vector<1x256xi1>
    %155 = vector.broadcast %154 : vector<1x256xi1> to vector<6x256xi1>
    %156 = vector.broadcast %cst_45 : f32 to vector<6x256xf32>
    %157 = arith.select %155, %153, %156 : vector<6x256xi1>, vector<6x256xf32>
    %158 = vector.extract_strided_slice %130 {offsets = [0, 33], sizes = [6, 256], strides = [1, 1]} : vector<6x290xf32> to vector<6x256xf32>
    %159 = vector.extract_strided_slice %130 {offsets = [0, 34], sizes = [6, 256], strides = [1, 1]} : vector<6x290xf32> to vector<6x256xf32>
    %cst_46 = arith.constant 0.000000e+00 : f32
    %160 = vector.shape_cast %22 : vector<1x256xi1> to vector<1x256xi1>
    %161 = vector.broadcast %160 : vector<1x256xi1> to vector<6x256xi1>
    %162 = vector.broadcast %cst_46 : f32 to vector<6x256xf32>
    %163 = arith.select %161, %159, %162 : vector<6x256xi1>, vector<6x256xf32>
    %164 = tpu.concatenate %135, %136, %141, %146, %147, %152, %157, %158, %163 in 0 : vector<6x256xf32>, vector<6x256xf32>, vector<6x256xf32>, vector<6x256xf32>, vector<6x256xf32>, vector<6x256xf32>, vector<6x256xf32>, vector<6x256xf32>, vector<6x256xf32> -> vector<54x256xf32>
    %cst_47 = arith.constant dense<0.000000e+00> : vector<6x256xf32>
    %165 = tpu.matmul %126, %164, %cst_47 {dimension_numbers = #tpu.dot_dimension_numbers<[1], [0], [0], [1], [0, 0, 1, 1], [], []>} : vector<6x54xf32>, vector<54x256xf32>, vector<6x256xf32> -> vector<6x256xf32>
    %166 = vector.broadcast %128 : vector<6x1xf32> to vector<6x256xf32>
    %167 = arith.addf %165, %166 : vector<6x256xf32>
    %cst_48 = arith.constant 0.000000e+00 : f32
    %168 = vector.broadcast %cst_48 : f32 to vector<6x256xf32>
    %169 = arith.maximumf %167, %168 : vector<6x256xf32>
    %170 = vector.extract_strided_slice %23 {offsets = [0, 16], sizes = [4, 6], strides = [1, 1]} : vector<4x40xf32> to vector<4x6xf32>
    %cst_49 = arith.constant dense<0.000000e+00> : vector<4x256xf32>
    %171 = tpu.matmul %170, %169, %cst_49 {dimension_numbers = #tpu.dot_dimension_numbers<[1], [0], [0], [1], [0, 0, 1, 1], [], []>} : vector<4x6xf32>, vector<6x256xf32>, vector<4x256xf32> -> vector<4x256xf32>
    %172 = arith.addf %124, %171 : vector<4x256xf32>
    %173 = vector.extract_strided_slice %75 {offsets = [2, 0, 0], sizes = [1, 6, 54], strides = [1, 1, 1]} : vector<5x6x54xf32> to vector<1x6x54xf32>
    %174 = vector.shape_cast %173 : vector<1x6x54xf32> to vector<6x54xf32>
    %175 = vector.extract_strided_slice %76 {offsets = [2, 0, 0], sizes = [1, 6, 1], strides = [1, 1, 1]} : vector<5x6x1xf32> to vector<1x6x1xf32>
    %176 = vector.shape_cast %175 : vector<1x6x1xf32> to vector<6x1xf32>
    %cst_50 = arith.constant 0.000000e+00 : f32
    %177 = vector.broadcast %cst_50 : f32 to vector<6x17xf32>
    %178 = tpu.concatenate %177, %169, %177 in 1 : vector<6x17xf32>, vector<6x256xf32>, vector<6x17xf32> -> vector<6x290xf32>
    %179 = vector.extract_strided_slice %178 {offsets = [0, 0], sizes = [6, 256], strides = [1, 1]} : vector<6x290xf32> to vector<6x256xf32>
    %cst_51 = arith.constant 0.000000e+00 : f32
    %180 = vector.shape_cast %20 : vector<1x256xi1> to vector<1x256xi1>
    %181 = vector.broadcast %180 : vector<1x256xi1> to vector<6x256xi1>
    %182 = vector.broadcast %cst_51 : f32 to vector<6x256xf32>
    %183 = arith.select %181, %179, %182 : vector<6x256xi1>, vector<6x256xf32>
    %184 = vector.extract_strided_slice %178 {offsets = [0, 1], sizes = [6, 256], strides = [1, 1]} : vector<6x290xf32> to vector<6x256xf32>
    %185 = vector.extract_strided_slice %178 {offsets = [0, 2], sizes = [6, 256], strides = [1, 1]} : vector<6x290xf32> to vector<6x256xf32>
    %cst_52 = arith.constant 0.000000e+00 : f32
    %186 = vector.shape_cast %22 : vector<1x256xi1> to vector<1x256xi1>
    %187 = vector.broadcast %186 : vector<1x256xi1> to vector<6x256xi1>
    %188 = vector.broadcast %cst_52 : f32 to vector<6x256xf32>
    %189 = arith.select %187, %185, %188 : vector<6x256xi1>, vector<6x256xf32>
    %190 = vector.extract_strided_slice %178 {offsets = [0, 16], sizes = [6, 256], strides = [1, 1]} : vector<6x290xf32> to vector<6x256xf32>
    %cst_53 = arith.constant 0.000000e+00 : f32
    %191 = vector.shape_cast %20 : vector<1x256xi1> to vector<1x256xi1>
    %192 = vector.broadcast %191 : vector<1x256xi1> to vector<6x256xi1>
    %193 = vector.broadcast %cst_53 : f32 to vector<6x256xf32>
    %194 = arith.select %192, %190, %193 : vector<6x256xi1>, vector<6x256xf32>
    %195 = vector.extract_strided_slice %178 {offsets = [0, 17], sizes = [6, 256], strides = [1, 1]} : vector<6x290xf32> to vector<6x256xf32>
    %196 = vector.extract_strided_slice %178 {offsets = [0, 18], sizes = [6, 256], strides = [1, 1]} : vector<6x290xf32> to vector<6x256xf32>
    %cst_54 = arith.constant 0.000000e+00 : f32
    %197 = vector.shape_cast %22 : vector<1x256xi1> to vector<1x256xi1>
    %198 = vector.broadcast %197 : vector<1x256xi1> to vector<6x256xi1>
    %199 = vector.broadcast %cst_54 : f32 to vector<6x256xf32>
    %200 = arith.select %198, %196, %199 : vector<6x256xi1>, vector<6x256xf32>
    %201 = vector.extract_strided_slice %178 {offsets = [0, 32], sizes = [6, 256], strides = [1, 1]} : vector<6x290xf32> to vector<6x256xf32>
    %cst_55 = arith.constant 0.000000e+00 : f32
    %202 = vector.shape_cast %20 : vector<1x256xi1> to vector<1x256xi1>
    %203 = vector.broadcast %202 : vector<1x256xi1> to vector<6x256xi1>
    %204 = vector.broadcast %cst_55 : f32 to vector<6x256xf32>
    %205 = arith.select %203, %201, %204 : vector<6x256xi1>, vector<6x256xf32>
    %206 = vector.extract_strided_slice %178 {offsets = [0, 33], sizes = [6, 256], strides = [1, 1]} : vector<6x290xf32> to vector<6x256xf32>
    %207 = vector.extract_strided_slice %178 {offsets = [0, 34], sizes = [6, 256], strides = [1, 1]} : vector<6x290xf32> to vector<6x256xf32>
    %cst_56 = arith.constant 0.000000e+00 : f32
    %208 = vector.shape_cast %22 : vector<1x256xi1> to vector<1x256xi1>
    %209 = vector.broadcast %208 : vector<1x256xi1> to vector<6x256xi1>
    %210 = vector.broadcast %cst_56 : f32 to vector<6x256xf32>
    %211 = arith.select %209, %207, %210 : vector<6x256xi1>, vector<6x256xf32>
    %212 = tpu.concatenate %183, %184, %189, %194, %195, %200, %205, %206, %211 in 0 : vector<6x256xf32>, vector<6x256xf32>, vector<6x256xf32>, vector<6x256xf32>, vector<6x256xf32>, vector<6x256xf32>, vector<6x256xf32>, vector<6x256xf32>, vector<6x256xf32> -> vector<54x256xf32>
    %cst_57 = arith.constant dense<0.000000e+00> : vector<6x256xf32>
    %213 = tpu.matmul %174, %212, %cst_57 {dimension_numbers = #tpu.dot_dimension_numbers<[1], [0], [0], [1], [0, 0, 1, 1], [], []>} : vector<6x54xf32>, vector<54x256xf32>, vector<6x256xf32> -> vector<6x256xf32>
    %214 = vector.broadcast %176 : vector<6x1xf32> to vector<6x256xf32>
    %215 = arith.addf %213, %214 : vector<6x256xf32>
    %cst_58 = arith.constant 0.000000e+00 : f32
    %216 = vector.broadcast %cst_58 : f32 to vector<6x256xf32>
    %217 = arith.maximumf %215, %216 : vector<6x256xf32>
    %218 = vector.extract_strided_slice %23 {offsets = [0, 22], sizes = [4, 6], strides = [1, 1]} : vector<4x40xf32> to vector<4x6xf32>
    %cst_59 = arith.constant dense<0.000000e+00> : vector<4x256xf32>
    %219 = tpu.matmul %218, %217, %cst_59 {dimension_numbers = #tpu.dot_dimension_numbers<[1], [0], [0], [1], [0, 0, 1, 1], [], []>} : vector<4x6xf32>, vector<6x256xf32>, vector<4x256xf32> -> vector<4x256xf32>
    %220 = arith.addf %172, %219 : vector<4x256xf32>
    %221 = vector.extract_strided_slice %75 {offsets = [3, 0, 0], sizes = [1, 6, 54], strides = [1, 1, 1]} : vector<5x6x54xf32> to vector<1x6x54xf32>
    %222 = vector.shape_cast %221 : vector<1x6x54xf32> to vector<6x54xf32>
    %223 = vector.extract_strided_slice %76 {offsets = [3, 0, 0], sizes = [1, 6, 1], strides = [1, 1, 1]} : vector<5x6x1xf32> to vector<1x6x1xf32>
    %224 = vector.shape_cast %223 : vector<1x6x1xf32> to vector<6x1xf32>
    %cst_60 = arith.constant 0.000000e+00 : f32
    %225 = vector.broadcast %cst_60 : f32 to vector<6x17xf32>
    %226 = tpu.concatenate %225, %217, %225 in 1 : vector<6x17xf32>, vector<6x256xf32>, vector<6x17xf32> -> vector<6x290xf32>
    %227 = vector.extract_strided_slice %226 {offsets = [0, 0], sizes = [6, 256], strides = [1, 1]} : vector<6x290xf32> to vector<6x256xf32>
    %cst_61 = arith.constant 0.000000e+00 : f32
    %228 = vector.shape_cast %20 : vector<1x256xi1> to vector<1x256xi1>
    %229 = vector.broadcast %228 : vector<1x256xi1> to vector<6x256xi1>
    %230 = vector.broadcast %cst_61 : f32 to vector<6x256xf32>
    %231 = arith.select %229, %227, %230 : vector<6x256xi1>, vector<6x256xf32>
    %232 = vector.extract_strided_slice %226 {offsets = [0, 1], sizes = [6, 256], strides = [1, 1]} : vector<6x290xf32> to vector<6x256xf32>
    %233 = vector.extract_strided_slice %226 {offsets = [0, 2], sizes = [6, 256], strides = [1, 1]} : vector<6x290xf32> to vector<6x256xf32>
    %cst_62 = arith.constant 0.000000e+00 : f32
    %234 = vector.shape_cast %22 : vector<1x256xi1> to vector<1x256xi1>
    %235 = vector.broadcast %234 : vector<1x256xi1> to vector<6x256xi1>
    %236 = vector.broadcast %cst_62 : f32 to vector<6x256xf32>
    %237 = arith.select %235, %233, %236 : vector<6x256xi1>, vector<6x256xf32>
    %238 = vector.extract_strided_slice %226 {offsets = [0, 16], sizes = [6, 256], strides = [1, 1]} : vector<6x290xf32> to vector<6x256xf32>
    %cst_63 = arith.constant 0.000000e+00 : f32
    %239 = vector.shape_cast %20 : vector<1x256xi1> to vector<1x256xi1>
    %240 = vector.broadcast %239 : vector<1x256xi1> to vector<6x256xi1>
    %241 = vector.broadcast %cst_63 : f32 to vector<6x256xf32>
    %242 = arith.select %240, %238, %241 : vector<6x256xi1>, vector<6x256xf32>
    %243 = vector.extract_strided_slice %226 {offsets = [0, 17], sizes = [6, 256], strides = [1, 1]} : vector<6x290xf32> to vector<6x256xf32>
    %244 = vector.extract_strided_slice %226 {offsets = [0, 18], sizes = [6, 256], strides = [1, 1]} : vector<6x290xf32> to vector<6x256xf32>
    %cst_64 = arith.constant 0.000000e+00 : f32
    %245 = vector.shape_cast %22 : vector<1x256xi1> to vector<1x256xi1>
    %246 = vector.broadcast %245 : vector<1x256xi1> to vector<6x256xi1>
    %247 = vector.broadcast %cst_64 : f32 to vector<6x256xf32>
    %248 = arith.select %246, %244, %247 : vector<6x256xi1>, vector<6x256xf32>
    %249 = vector.extract_strided_slice %226 {offsets = [0, 32], sizes = [6, 256], strides = [1, 1]} : vector<6x290xf32> to vector<6x256xf32>
    %cst_65 = arith.constant 0.000000e+00 : f32
    %250 = vector.shape_cast %20 : vector<1x256xi1> to vector<1x256xi1>
    %251 = vector.broadcast %250 : vector<1x256xi1> to vector<6x256xi1>
    %252 = vector.broadcast %cst_65 : f32 to vector<6x256xf32>
    %253 = arith.select %251, %249, %252 : vector<6x256xi1>, vector<6x256xf32>
    %254 = vector.extract_strided_slice %226 {offsets = [0, 33], sizes = [6, 256], strides = [1, 1]} : vector<6x290xf32> to vector<6x256xf32>
    %255 = vector.extract_strided_slice %226 {offsets = [0, 34], sizes = [6, 256], strides = [1, 1]} : vector<6x290xf32> to vector<6x256xf32>
    %cst_66 = arith.constant 0.000000e+00 : f32
    %256 = vector.shape_cast %22 : vector<1x256xi1> to vector<1x256xi1>
    %257 = vector.broadcast %256 : vector<1x256xi1> to vector<6x256xi1>
    %258 = vector.broadcast %cst_66 : f32 to vector<6x256xf32>
    %259 = arith.select %257, %255, %258 : vector<6x256xi1>, vector<6x256xf32>
    %260 = tpu.concatenate %231, %232, %237, %242, %243, %248, %253, %254, %259 in 0 : vector<6x256xf32>, vector<6x256xf32>, vector<6x256xf32>, vector<6x256xf32>, vector<6x256xf32>, vector<6x256xf32>, vector<6x256xf32>, vector<6x256xf32>, vector<6x256xf32> -> vector<54x256xf32>
    %cst_67 = arith.constant dense<0.000000e+00> : vector<6x256xf32>
    %261 = tpu.matmul %222, %260, %cst_67 {dimension_numbers = #tpu.dot_dimension_numbers<[1], [0], [0], [1], [0, 0, 1, 1], [], []>} : vector<6x54xf32>, vector<54x256xf32>, vector<6x256xf32> -> vector<6x256xf32>
    %262 = vector.broadcast %224 : vector<6x1xf32> to vector<6x256xf32>
    %263 = arith.addf %261, %262 : vector<6x256xf32>
    %cst_68 = arith.constant 0.000000e+00 : f32
    %264 = vector.broadcast %cst_68 : f32 to vector<6x256xf32>
    %265 = arith.maximumf %263, %264 : vector<6x256xf32>
    %266 = vector.extract_strided_slice %23 {offsets = [0, 28], sizes = [4, 6], strides = [1, 1]} : vector<4x40xf32> to vector<4x6xf32>
    %cst_69 = arith.constant dense<0.000000e+00> : vector<4x256xf32>
    %267 = tpu.matmul %266, %265, %cst_69 {dimension_numbers = #tpu.dot_dimension_numbers<[1], [0], [0], [1], [0, 0, 1, 1], [], []>} : vector<4x6xf32>, vector<6x256xf32>, vector<4x256xf32> -> vector<4x256xf32>
    %268 = arith.addf %220, %267 : vector<4x256xf32>
    %269 = vector.extract_strided_slice %75 {offsets = [4, 0, 0], sizes = [1, 6, 54], strides = [1, 1, 1]} : vector<5x6x54xf32> to vector<1x6x54xf32>
    %270 = vector.shape_cast %269 : vector<1x6x54xf32> to vector<6x54xf32>
    %271 = vector.extract_strided_slice %76 {offsets = [4, 0, 0], sizes = [1, 6, 1], strides = [1, 1, 1]} : vector<5x6x1xf32> to vector<1x6x1xf32>
    %272 = vector.shape_cast %271 : vector<1x6x1xf32> to vector<6x1xf32>
    %cst_70 = arith.constant 0.000000e+00 : f32
    %273 = vector.broadcast %cst_70 : f32 to vector<6x17xf32>
    %274 = tpu.concatenate %273, %265, %273 in 1 : vector<6x17xf32>, vector<6x256xf32>, vector<6x17xf32> -> vector<6x290xf32>
    %275 = vector.extract_strided_slice %274 {offsets = [0, 0], sizes = [6, 256], strides = [1, 1]} : vector<6x290xf32> to vector<6x256xf32>
    %cst_71 = arith.constant 0.000000e+00 : f32
    %276 = vector.shape_cast %20 : vector<1x256xi1> to vector<1x256xi1>
    %277 = vector.broadcast %276 : vector<1x256xi1> to vector<6x256xi1>
    %278 = vector.broadcast %cst_71 : f32 to vector<6x256xf32>
    %279 = arith.select %277, %275, %278 : vector<6x256xi1>, vector<6x256xf32>
    %280 = vector.extract_strided_slice %274 {offsets = [0, 1], sizes = [6, 256], strides = [1, 1]} : vector<6x290xf32> to vector<6x256xf32>
    %281 = vector.extract_strided_slice %274 {offsets = [0, 2], sizes = [6, 256], strides = [1, 1]} : vector<6x290xf32> to vector<6x256xf32>
    %cst_72 = arith.constant 0.000000e+00 : f32
    %282 = vector.shape_cast %22 : vector<1x256xi1> to vector<1x256xi1>
    %283 = vector.broadcast %282 : vector<1x256xi1> to vector<6x256xi1>
    %284 = vector.broadcast %cst_72 : f32 to vector<6x256xf32>
    %285 = arith.select %283, %281, %284 : vector<6x256xi1>, vector<6x256xf32>
    %286 = vector.extract_strided_slice %274 {offsets = [0, 16], sizes = [6, 256], strides = [1, 1]} : vector<6x290xf32> to vector<6x256xf32>
    %cst_73 = arith.constant 0.000000e+00 : f32
    %287 = vector.shape_cast %20 : vector<1x256xi1> to vector<1x256xi1>
    %288 = vector.broadcast %287 : vector<1x256xi1> to vector<6x256xi1>
    %289 = vector.broadcast %cst_73 : f32 to vector<6x256xf32>
    %290 = arith.select %288, %286, %289 : vector<6x256xi1>, vector<6x256xf32>
    %291 = vector.extract_strided_slice %274 {offsets = [0, 17], sizes = [6, 256], strides = [1, 1]} : vector<6x290xf32> to vector<6x256xf32>
    %292 = vector.extract_strided_slice %274 {offsets = [0, 18], sizes = [6, 256], strides = [1, 1]} : vector<6x290xf32> to vector<6x256xf32>
    %cst_74 = arith.constant 0.000000e+00 : f32
    %293 = vector.shape_cast %22 : vector<1x256xi1> to vector<1x256xi1>
    %294 = vector.broadcast %293 : vector<1x256xi1> to vector<6x256xi1>
    %295 = vector.broadcast %cst_74 : f32 to vector<6x256xf32>
    %296 = arith.select %294, %292, %295 : vector<6x256xi1>, vector<6x256xf32>
    %297 = vector.extract_strided_slice %274 {offsets = [0, 32], sizes = [6, 256], strides = [1, 1]} : vector<6x290xf32> to vector<6x256xf32>
    %cst_75 = arith.constant 0.000000e+00 : f32
    %298 = vector.shape_cast %20 : vector<1x256xi1> to vector<1x256xi1>
    %299 = vector.broadcast %298 : vector<1x256xi1> to vector<6x256xi1>
    %300 = vector.broadcast %cst_75 : f32 to vector<6x256xf32>
    %301 = arith.select %299, %297, %300 : vector<6x256xi1>, vector<6x256xf32>
    %302 = vector.extract_strided_slice %274 {offsets = [0, 33], sizes = [6, 256], strides = [1, 1]} : vector<6x290xf32> to vector<6x256xf32>
    %303 = vector.extract_strided_slice %274 {offsets = [0, 34], sizes = [6, 256], strides = [1, 1]} : vector<6x290xf32> to vector<6x256xf32>
    %cst_76 = arith.constant 0.000000e+00 : f32
    %304 = vector.shape_cast %22 : vector<1x256xi1> to vector<1x256xi1>
    %305 = vector.broadcast %304 : vector<1x256xi1> to vector<6x256xi1>
    %306 = vector.broadcast %cst_76 : f32 to vector<6x256xf32>
    %307 = arith.select %305, %303, %306 : vector<6x256xi1>, vector<6x256xf32>
    %308 = tpu.concatenate %279, %280, %285, %290, %291, %296, %301, %302, %307 in 0 : vector<6x256xf32>, vector<6x256xf32>, vector<6x256xf32>, vector<6x256xf32>, vector<6x256xf32>, vector<6x256xf32>, vector<6x256xf32>, vector<6x256xf32>, vector<6x256xf32> -> vector<54x256xf32>
    %cst_77 = arith.constant dense<0.000000e+00> : vector<6x256xf32>
    %309 = tpu.matmul %270, %308, %cst_77 {dimension_numbers = #tpu.dot_dimension_numbers<[1], [0], [0], [1], [0, 0, 1, 1], [], []>} : vector<6x54xf32>, vector<54x256xf32>, vector<6x256xf32> -> vector<6x256xf32>
    %310 = vector.broadcast %272 : vector<6x1xf32> to vector<6x256xf32>
    %311 = arith.addf %309, %310 : vector<6x256xf32>
    %cst_78 = arith.constant 0.000000e+00 : f32
    %312 = vector.broadcast %cst_78 : f32 to vector<6x256xf32>
    %313 = arith.maximumf %311, %312 : vector<6x256xf32>
    %314 = vector.extract_strided_slice %23 {offsets = [0, 34], sizes = [4, 6], strides = [1, 1]} : vector<4x40xf32> to vector<4x6xf32>
    %cst_79 = arith.constant dense<0.000000e+00> : vector<4x256xf32>
    %315 = tpu.matmul %314, %313, %cst_79 {dimension_numbers = #tpu.dot_dimension_numbers<[1], [0], [0], [1], [0, 0, 1, 1], [], []>} : vector<4x6xf32>, vector<6x256xf32>, vector<4x256xf32> -> vector<4x256xf32>
    %316 = arith.addf %268, %315 : vector<4x256xf32>
    %cst_80 = arith.constant 0.000000e+00 : f32
    %317 = vector.broadcast %cst_80 : f32 to vector<4x256xf32>
    %318 = arith.maximumf %316, %317 : vector<4x256xf32>
    %c0_81 = arith.constant 0 : index
    %c0_82 = arith.constant 0 : index
    %319 = vector.load %arg8[%c0_81, %c0_82] : memref<8x4xf32, #tpu.memory_space<vmem>>, vector<8x4xf32>
    %cst_83 = arith.constant dense<0.000000e+00> : vector<8x256xf32>
    %320 = tpu.matmul %319, %318, %cst_83 {dimension_numbers = #tpu.dot_dimension_numbers<[1], [0], [0], [1], [0, 0, 1, 1], [], []>} : vector<8x4xf32>, vector<4x256xf32>, vector<8x256xf32> -> vector<8x256xf32>
    %c0_84 = arith.constant 0 : index
    %c0_85 = arith.constant 0 : index
    %321 = vector.load %arg9[%c0_84, %c0_85] : memref<8x1xf32, #tpu.memory_space<vmem>>, vector<8x1xf32>
    %322 = vector.broadcast %321 : vector<8x1xf32> to vector<8x256xf32>
    %323 = arith.addf %320, %322 : vector<8x256xf32>
    %cst_86 = arith.constant 0.000000e+00 : f32
    %324 = vector.broadcast %cst_86 : f32 to vector<8x256xf32>
    %325 = arith.maximumf %323, %324 : vector<8x256xf32>
    %326 = vector.shape_cast %325 : vector<8x256xf32> to vector<1x8x256xf32>
    %c0_87 = arith.constant 0 : index
    %c0_88 = arith.constant 0 : index
    %c0_89 = arith.constant 0 : index
    %327 = vector.load %arg10[%c0_87, %c0_88, %c0_89] : memref<1x8x256xf32, #tpu.memory_space<vmem>>, vector<1x8x256xf32>
    tpu.vector_store %arg10[%c0_87, %c0_88, %c0_89], %326 {strides = array<i32>} : memref<1x8x256xf32, #tpu.memory_space<vmem>>, vector<1x8x256xf32>,
    return
  }
  func.func @transform_0(%arg0: i32) -> (i32, i32, i32) {
    %c0_i32 = arith.constant 0 : i32
    %c0_i32_0 = arith.constant 0 : i32
    %c0_i32_1 = arith.constant 0 : i32
    return %arg0, %c0_i32, %c0_i32_0 : i32, i32, i32
  }
  func.func @transform_1(%arg0: i32) -> (i32, i32) {
    %c0_i32 = arith.constant 0 : i32
    %c0_i32_0 = arith.constant 0 : i32
    %c0_i32_1 = arith.constant 0 : i32
    return %c0_i32, %c0_i32_0 : i32, i32
  }
  func.func @transform_2(%arg0: i32) -> (i32, i32) {
    %c0_i32 = arith.constant 0 : i32
    %c0_i32_0 = arith.constant 0 : i32
    %c0_i32_1 = arith.constant 0 : i32
    return %c0_i32, %c0_i32_0 : i32, i32
  }
  func.func @transform_3(%arg0: i32) -> (i32, i32, i32) {
    %c0_i32 = arith.constant 0 : i32
    %c0_i32_0 = arith.constant 0 : i32
    %c0_i32_1 = arith.constant 0 : i32
    %c0_i32_2 = arith.constant 0 : i32
    return %c0_i32, %c0_i32_0, %c0_i32_1 : i32, i32, i32
  }
  func.func @transform_4(%arg0: i32) -> (i32, i32, i32) {
    %c0_i32 = arith.constant 0 : i32
    %c0_i32_0 = arith.constant 0 : i32
    %c0_i32_1 = arith.constant 0 : i32
    %c0_i32_2 = arith.constant 0 : i32
    return %c0_i32, %c0_i32_0, %c0_i32_1 : i32, i32, i32
  }
  func.func @transform_5(%arg0: i32) -> (i32, i32) {
    %c0_i32 = arith.constant 0 : i32
    %c0_i32_0 = arith.constant 0 : i32
    %c0_i32_1 = arith.constant 0 : i32
    return %c0_i32, %c0_i32_0 : i32, i32
  }
  func.func @transform_6(%arg0: i32) -> (i32, i32) {
    %c0_i32 = arith.constant 0 : i32
    %c0_i32_0 = arith.constant 0 : i32
    %c0_i32_1 = arith.constant 0 : i32
    return %c0_i32, %c0_i32_0 : i32, i32
  }
  func.func @transform_7(%arg0: i32) -> (i32, i32) {
    %c0_i32 = arith.constant 0 : i32
    %c0_i32_0 = arith.constant 0 : i32
    %c0_i32_1 = arith.constant 0 : i32
    return %c0_i32, %c0_i32_0 : i32, i32
  }
  func.func @transform_8(%arg0: i32) -> (i32, i32) {
    %c0_i32 = arith.constant 0 : i32
    %c0_i32_0 = arith.constant 0 : i32
    %c0_i32_1 = arith.constant 0 : i32
    return %c0_i32, %c0_i32_0 : i32, i32
  }
  func.func @transform_9(%arg0: i32) -> (i32, i32, i32) {
    %c0_i32 = arith.constant 0 : i32
    %c0_i32_0 = arith.constant 0 : i32
    %c0_i32_1 = arith.constant 0 : i32
    return %arg0, %c0_i32, %c0_i32_0 : i32, i32, i32
  }
}

</mosaic_0001>

<bundles_post_ra>
// kernel: tpu_custom_call.1
= control target key start
LH: loop header
LB: loop body
LE: loop exit
PB: predicated region body
PF: predicated region fallthrough
CT: control target
= control target key end

     0   :  { %14 = vsyncpa [#allocation3], 0  ;;  %s3850_s0 = inlined_call_operand.vmem [shape: f32[2,4,256], index: 0, kind: input, shape index: {}]   ;;  %s3851_s1 = inlined_call_operand.vmem [shape: f32[6,36], index: 1, kind: input, shape index: {}]   ;;  %s3852_s2 = inlined_call_operand.vmem [shape: f32[6,1], index: 2, kind: input, shape index: {}]   ;;  %s3853_s3 = inlined_call_operand.vmem [shape: f32[5,6,54], index: 3, kind: input, shape index: {}]   ;;  %s3854_s4 = inlined_call_operand.vmem [shape: f32[5,6,1], index: 4, kind: input, shape index: {}]   ;;  %s3855_s5 = inlined_call_operand.vmem [shape: f32[4,40], index: 5, kind: input, shape index: {}]   ;;  %s3856_s6 = inlined_call_operand.vmem [shape: f32[4,1], index: 6, kind: input, shape index: {}]   ;;  %s3857_s7 = inlined_call_operand.vmem [shape: f32[8,4], index: 7, kind: input, shape index: {}]   ;;  %s3858_s8 = inlined_call_operand.vmem [shape: f32[8,1], index: 8, kind: input, shape index: {}]   ;;  %s3859_s9 = inlined_call_operand.hbm [shape: f32[2,8,256], index: 9, kind: output, shape index: {}]  }
   0x1   :  { %16 = vsyncpa [#allocation3 + $0x1], 0  ;;  %s3066_s30 = smov 0   ;;  %s3068_s10 = smov 0  }
   0x2   :  { %s3070_s11 = smov 0   ;;  %s3072_s12 = smov 0  }
   0x3 LB: > { %s3087_s13 = sadd.s32 4294967295, %s2998_s12   ;;  %s2530_s14 = sadd.s32 4294967294, %s2998_s12   ;;  %s2998_s12 = sphi %s3072_s12, %s3910_s12   ;;  %s2994_s11 = sphi %s3070_s11, %s3909_s11   ;;  %s2990_s10 = sphi %s3068_s10, %s3908_s10   ;;  %s2986_s30 = sphi %s3066_s30, %s3907_s30  }
   0x4   : > { %s3091_s15 = sadd.s32 1, %s2998_s12   ;;  %s223_s16 = sadd.s32 1, %s2994_s11 }
   0x5   : > { %s220_s17 = ssub.s32 %s2998_s12, %s3091_s15  ;;  %p233_p0 = scmp.ne.s32.totalorder %s2994_s11, %s2990_s10 }
   0x6   : > { %p221_p1 = scmp.eq.s32.totalorder %s220_s17, 0  ;;  %p234_p2 = scmp.eq.s32.totalorder %s3087_s13, 1 }
   0x7   : > { %p239_p3 = scmp.ne.s32.totalorder %s2990_s10, %s2986_s30  ;;  %p240_p4 = scmp.eq.s32.totalorder %s2530_s14, 1 }
   0x8   : > { %s3102_s18 = scalar_select %p221_p1, %s2994_s11, %s223_s16  }
   0x9   : > { %p3104_p5 = por %p234_p2, %p233_p0  ;;  %p3108_p6 = por %p240_p4, %p239_p3 }
   0xa   : > { %p2533_p7 = scmp.ge.s32.totalorder %s2998_s12, 1  ;;  %p290_p8 = scmp.lt.s32.totalorder %s2998_s12, 3 }
   0xc   : > { %p291_p9 = pnand %p2533_p7, %p290_p8 }
   0xd   : > { %p326_p10 = scmp.lt.s32.totalorder (!%p291_p9), %s3087_s13, 1  ;;  %s3000_s26 = smov (!%p291_p9), 17   ;;  %vm458_vm0 = vcmask (!%p291_p9), 138240   ;;  %vm376_vm1 = vcmask (!%p291_p9), 1043456   ;;  %v3008_v12 = vmov (!%p291_p9), 0.0   ;;  %v3009_v13 = vmov (!%p291_p9), 0  }
   0xe   : > { %294 = sbr.rel (%p291_p9) target bundleno = 3385 (0xd39), region = 56  ;;  %s3001_s27 = smov (!%p291_p9), 112   ;;  %677 = vmatprep.mubr.f32.mxu1 (!%p291_p9), %v3008_v12  ;;  %2757 = vset.pattern.permute.xlu1 (!%p291_p9), %v3009_v13  ;;  %v453_v14 = vld [vmem:[%s3852_s2] sm:$0x3f] (!%p291_p9)  ;;  %v332_v16 = vlaneseq (!%p291_p9)  ;;  %vm522_vm6 = vcmask (!%p291_p9), 785408   ;;  %vm496_vm7 = vcmask (!%p291_p9), 916480  }
   0xf   : > { %s3002_s28 = smov (!%p291_p9), 126   ;;  %s3003_s29 = smov (!%p291_p9), 110   ;;  %445 = vmatprep.mubr.f32.mxu0 (!%p291_p9), %v3008_v12  ;;  %2793 = vset.pattern.permute.xlu0 (!%p291_p9), %v3009_v13  ;;  %vm483_vm8 = vcmask (!%p291_p9), 1031168   ;;  %vm3867_vm9 = vcmask (!%p291_p9), 900096   ;;  %vm3866_vm10 = vcmask (!%p291_p9), 908288   ;;  %vm3865_vm11 = vcmask (!%p291_p9), 1039360  }
  0x10   : > { %s3004_s14 = smov (!%p291_p9), 127   ;;  %s3005_s16 = smov (!%p291_p9), 96   ;;  %v333_v18 = vand.u32 (!%p291_p9), 127, %v332_v16  ;;  %vm3864_vm12 = vcmask (!%p291_p9), 777216   ;;  %vm535_vm13 = vcmask (!%p291_p9), 769024   ;;  %vm603_vm14 = vcmask (!%p291_p9), 293888  }
  0x11   : > { %s3006_s17 = smov (!%p291_p9), 111   ;;  %vm3862_vm15 = vcmask (!%p291_p9), 31744   ;;  %s3012_s23 = smov (!%p291_p9), 118  }
  0x12   : > { %v334_v20 = vadd.s32 (!%p291_p9), 128, %v333_v18  ;;  %v339_v22 = vand.u32 (!%p291_p9), 15, %v333_v18  ;;  %s3013_s24 = smov (!%p291_p9), 106  }
  0x14   : > { %v346_v24 = vand.u32 (!%p291_p9), 15, %v334_v20  ;;  %vm3162_vm2 = vcmp.gt.s32.totalorder (!%p291_p9), %v339_v22, 0  ;;  %vm3174_vm5 = vcmp.lt.s32.totalorder (!%p291_p9), %v339_v22, 15 }
  0x15   : > { %s327_s21 = scalar_select %p326_p10, %s3087_s13, 1 }
  0x16   : > { %vm3166_vm3 = vcmp.gt.s32.totalorder %v346_v24, 0  ;;  %vm3170_vm4 = vcmp.lt.s32.totalorder %v346_v24, 15 }
  0x17   : > { %s2584_s22 = sshll.u32 %s327_s21, 3  ;;  %s3007_s21 = smov 95  }
  0x18   : > { %s330_s25 = scalar_lea.vmem %s3850_s0, %s2584_s22  ;;  %s3860_s22 = smov 94  }
  0x19   : > { %v331_v0 = vld [vmem:[%s330_s25] sm:$0xff]  ;;  %s3878_s25 = smov 94  }
  0x1a   : > { %454 = vrot.lane.b32.xlu0 %v331_v0, %s3000_s26  ;;  %v371_v1 = vcombine.high %v331_v0, %v331_v0 }
  0x1c   : > { %2537 = vmatprep.subr.msk.mxu0 %vm376_vm1, %v371_v1 }
  0x1d   : > { %2538 = vmatpush1.msk.msra.mxu0 %vm376_vm1, %v331_v0 }
  0x1e   : > { %456 = vrot.lane.b32.xlu0 %v371_v1, %s3000_s26 }
  0x8c   : > { %v455_v2 = vpop.permute.xlu0 %454 }
  0x8d   : > { %v3122_v3 = vsel %vm458_vm0, 0.0, %v455_v2 }
  0x8e   : > { %490 = vrot.lane.b32.xlu1 %v3122_v3, %s3001_s27  ;;  %v542_v8 = vrot.slane %v3122_v3, 4  ;;  %v469_v34 = vsel %vm3162_vm2, %v3122_v3, 0.0 }
  0x90   : > { %v457_v4 = vpop.permute.xlu0 %456 }
  0x91   : > { %v3127_v5 = vsel %vm458_vm0, %v455_v2, %v457_v4  ;;  %v464_v6 = vsel %vm458_vm0, %v457_v4, 0.0 }
  0x92   : > { %477 = vrot.lane.b32.xlu1 %v3122_v3, %s3002_s28  ;;  %v2727_v7 = vpack.i.bf16 %v464_v6, %v3127_v5  ;;  %v543_v9 = vrot.slane %v3127_v5, 4  ;;  %v544_v10 = vrot.slane %v464_v6, 4  ;;  %v470_v37 = vsel %vm3166_vm3, %v3127_v5, 0.0 }
  0x94   : > { %2728 = vrot.lane.b32.xlu0 %v2727_v7, %s3002_s28  ;;  %v2747_v11 = vpack.i.bf16 %v544_v10, %v543_v9 }
  0x96   : > { %503 = vrot.lane.b32.xlu1 %v3122_v3, %s3003_s29 }
  0x98   : > { %545 = vrot.lane.b32.xlu0 %v542_v8, %s3004_s14 }
  0x9a   : > { %516 = vrot.lane.b32.xlu1 %v3122_v3, %s3005_s16 }
  0x9c   : > { %2738 = vrot.lane.b32.xlu0 %v2727_v7, %s3005_s16 }
  0x9e   : > { %2723 = vrot.lane.b32.xlu1 %v2727_v7, %s3001_s27 }
  0xa0   : > { %2743 = vrot.lane.b32.xlu0 %v2727_v7, %s3006_s17 }
  0xa2   : > { %2733 = vrot.lane.b32.xlu1 %v2727_v7, %s3003_s29 }
  0xa4   : > { %2748 = vrot.lane.b32.xlu0 %v2747_v11, %s3004_s14 }
  0xa6   : > { %2753 = vrot.lane.b32.xlu1 %v2747_v11, %s3007_s21 }
  0xa8   : > { %562 = vrot.lane.b32.xlu0 %v3122_v3, %s3006_s17 }
  0xaa   : > { %579 = vrot.lane.b32.xlu1 %v542_v8, %s3007_s21 }
  0xac   : > { %531 = vrot.lane.b32.xlu0 %v3127_v5, %s3860_s22 }
  0xae   : > { %533 = vrot.lane.b32.xlu1 %v464_v6, %s3860_s22 }
  0xb0   : > { %529 = vrot.lane.b32.xlu0 %v3122_v3, %s3860_s22  ;;  %s3011_s22 = smov 124  }
  0xb2   : > { %600 = vperm.xlu1 %2757, %v453_v14  }
 0x100   : > { %v491_v15 = vpop.permute.xlu1 %490 }
 0x104   : > { %v478_v17 = vpop.permute.xlu1 %477 }
 0x106   : > { %v2729_v19 = vpop.permute.xlu0 %2728 }
 0x107   : > { %v2731_v29 = vunpack.i.h.bf16 %v2729_v19  ;;  %v2730_v30 = vunpack.i.l.bf16 %v2729_v19 }
 0x108   : > { %v504_v21 = vpop.permute.xlu1 %503 }
 0x109   : > { %v485_v42 = vsel %vm483_vm8, %v2730_v30, %v2731_v29  ;;  %v484_v44 = vsel %vm483_vm8, %v478_v17, %v2730_v30 }
 0x10a   : > { %v546_v23 = vpop.permute.xlu0 %545  ;;  %v489_v55 = vsel %vm3170_vm4, %v485_v42, 0.0  ;;  %v488_v56 = vsel %vm3174_vm5, %v484_v44, 0.0 }
 0x10c   : > { %v517_v25 = vpop.permute.xlu1 %516 }
 0x10e   : > { %v2739_v27 = vpop.permute.xlu0 %2738 }
 0x10f   : > { %v2741_v38 = vunpack.i.h.bf16 %v2739_v27  ;;  %v2740_v39 = vunpack.i.l.bf16 %v2739_v27 }
 0x110   : > { %v2724_v33 = vpop.permute.xlu1 %2723 }
 0x111   : > { %v2726_v35 = vunpack.i.h.bf16 %v2724_v33  ;;  %v2725_v36 = vunpack.i.l.bf16 %v2724_v33  ;;  %v524_v53 = vsel %vm522_vm6, %v2740_v39, %v2741_v38  ;;  %v523_v1 = vsel %vm522_vm6, %v517_v25, %v2740_v39 }
 0x112   : > { %v2744_v40 = vpop.permute.xlu0 %2743  ;;  %v528_v20 = vsel %vm3166_vm3, %v524_v53, 0.0  ;;  %v527_v22 = vsel %vm3162_vm2, %v523_v1, 0.0 }
 0x113   : > { %v497_v41 = vsel %vm496_vm7, %v491_v15, %v2725_v36  ;;  %v498_v43 = vsel %vm496_vm7, %v2725_v36, %v2726_v35  ;;  %v2746_v45 = vunpack.i.h.bf16 %v2744_v40  ;;  %v2745_v46 = vunpack.i.l.bf16 %v2744_v40  ;;  %v452_v40 = vld [vmem:[%s3851_s1] sm:$0x3f] }
 0x114   : > { %v2734_v47 = vpop.permute.xlu1 %2733  ;;  %v502_v48 = vsel %vm3166_vm3, %v498_v43, 0.0  ;;  %v501_v49 = vsel %vm3162_vm2, %v497_v41, 0.0  ;;  %v3237_v41 = vld [vmem:[%s3855_s5] sm:$0xf] }
 0x115   : > { %v2736_v50 = vunpack.i.h.bf16 %v2734_v47  ;;  %v2735_v51 = vunpack.i.l.bf16 %v2734_v47  ;;  %v559_v52 = vrot.slane %v502_v48, 4  ;;  %v558_v57 = vrot.slane %v501_v49, 4  ;;  %2539 = vmatmul.mubr.msk.f32.vlgmr.msra.gmra.mrb[0].mxu0 %vm3862_vm15, %v3237_v41 }
 0x116   : > { %v2749_v54 = vpop.permute.xlu0 %2748  ;;  %v570_v2 = vsel %vm3866_vm10, %v2745_v46, %v2746_v45  ;;  %762 = vmatprep.mubr.f32.mxu0 %v3008_v12  ;;  %vm3863_vm15 = vcmask 48128  }
 0x117   : > { %v510_v58 = vsel %vm3867_vm9, %v504_v21, %v2735_v51  ;;  %v511_v59 = vsel %vm3867_vm9, %v2735_v51, %v2736_v50  ;;  %v2751_v60 = vunpack.i.h.bf16 %v2749_v54  ;;  %v2750_v61 = vunpack.i.l.bf16 %v2749_v54 }
 0x118   : > { %v515_v62 = vsel %vm3170_vm4, %v511_v59, 0.0  ;;  %v2754_v63 = vpop.permute.xlu1 %2753  ;;  %v514_v0 = vsel %vm3174_vm5, %v510_v58, 0.0  ;;  %v593_v6 = vsel %vm376_vm1, %v489_v55, %v559_v52  ;;  %v592_v11 = vsel %vm376_vm1, %v488_v56, %v558_v57 }
 0x119   : > { %v576_v3 = vrot.slane %v515_v62, 4  ;;  %v2756_v4 = vunpack.i.h.bf16 %v2754_v63  ;;  %v2755_v5 = vunpack.i.l.bf16 %v2754_v63  ;;  %v575_v7 = vrot.slane %v514_v0, 4  ;;  %v776_v0 = vld [vmem:[%s3854_s4] sm:$0x3f] }
 0x11a   : > { %v563_v8 = vpop.permute.xlu0 %562  ;;  %v553_v9 = vsel %vm3865_vm11, %v2750_v61, %v2751_v60  ;;  %v552_v10 = vsel %vm3865_vm11, %v546_v23, %v2750_v61 }
 0x11b   : > { %v569_v13 = vsel %vm3866_vm10, %v563_v8, %v2745_v46  ;;  %v591_v14 = vsel %vm376_vm1, %v470_v37, %v553_v9  ;;  %v590_v15 = vsel %vm376_vm1, %v469_v34, %v552_v10  ;;  %v587_v16 = vsel %vm3864_vm12, %v2755_v5, %v2756_v4 }
 0x11c   : > { %v580_v17 = vpop.permute.xlu1 %579  ;;  %v2586_v18 = vpack.c.bf16 %v593_v6, %v591_v14  ;;  %v2588_v19 = vpack.c.bf16 %v592_v11, %v590_v15  ;;  %v595_v21 = vsel %vm376_vm1, %v570_v2, %v576_v3  ;;  %v597_v24 = vsel %vm376_vm1, %v528_v20, %v587_v16 }
 0x11d   : > { %v586_v23 = vsel %vm3864_vm12, %v580_v17, %v2755_v5  ;;  %v594_v25 = vsel %vm376_vm1, %v569_v13, %v575_v7  ;;  %v2590_v30 = vpack.c.bf16 %v597_v24, %v595_v21 }
 0x11e   : > { %v596_v27 = vsel %vm376_vm1, %v527_v22, %v586_v23  ;;  %2587 = vmatprep.subr.bf16.mxu1 %v2586_v18  ;;  %v532_v29 = vpop.permute.xlu0 %531 }
 0x11f   : > { %2589 = vmatpush1.bf16.msra.mxu1 %v2588_v19  ;;  %v2592_v33 = vpack.c.bf16 %v596_v27, %v594_v25 }
 0x120   : > { %2591 = vmatprep.subr.bf16.mxu1 %v2590_v30  ;;  %v534_v34 = vpop.permute.xlu1 %533 }
 0x121   : > { %v537_v35 = vsel %vm535_vm13, %v532_v29, %v534_v34 }
 0x122   : > { %v541_v36 = vsel %vm3170_vm4, %v537_v35, 0.0  ;;  %v530_v37 = vpop.permute.xlu0 %529 }
 0x123   : > { %v536_v38 = vsel %vm535_vm13, %v530_v37, %v532_v29  ;;  %2593 = vmatpush1.bf16.msra.mxu1 %v2592_v33 }
 0x124   : > { %v540_v39 = vsel %vm3174_vm5, %v536_v38, 0.0  ;;  %2540 = vmatprep.subr.msk.mxu1 %vm376_vm1, %v541_v36 }
 0x127   : > { %2541 = vmatpush1.msk.msra.mxu1 %vm376_vm1, %v540_v39 }
 0x128   : > { %2542 = vmatmul.mubr.msk.f32.vlgmr.msra.gmra.mrb[0].mxu1 %vm603_vm14, %v452_v40  ;;  %vm691_vm14 = vcmask 1045504  }
 0x129   : > { %1323 = vmatprep.mubr.f32.mxu1 %v3008_v12 }
 0x131   : > { %v601_v42 = vpop.permute.xlu1 %600 }
 0x1fb   : > { %v679_v43 = vpop.f32.mrb[0].mxu1 }
 0x1fc   : > { %v680_v44 = vadd.f32 %v679_v43, %v601_v42  ;;  %v681_v45 = vpop.f32.mrb[1].mxu1 }
 0x1fd   : > { %v682_v46 = vadd.f32 %v681_v45, %v601_v42 }
 0x1fe   : > { %v684_v47 = vmax.f32 %v680_v44, 0.0 }
 0x1ff   : > { %v685_v48 = vmax.f32 %v682_v46, 0.0 }
 0x200   : > { %781 = vrot.lane.b32.xlu0 %v684_v47, %s3000_s26 }
 0x201   : > { %783 = vrot.lane.b32.xlu1 %v685_v48, %s3000_s26  ;;  %2543 = vmatprep.subr.msk.mxu0 %vm691_vm14, %v685_v48 }
 0x202   : > { %2544 = vmatpush1.msk.msra.mxu0 %vm691_vm14, %v684_v47 }
 0x205   : > { %686 = vrot.lane.b32.xlu1 %v3237_v41, %s3011_s22 }
 0x272   : > { %v782_v49 = vpop.permute.xlu0 %781 }
 0x273   : > { %v3248_v50 = vsel %vm458_vm0, 0.0, %v782_v49  ;;  %v784_v51 = vpop.permute.xlu1 %783 }
 0x274   : > { %v3251_v52 = vsel %vm458_vm0, %v782_v49, %v784_v51  ;;  %v790_v53 = vsel %vm458_vm0, %v784_v51, 0.0  ;;  %807 = vrot.lane.b32.xlu0 %v3248_v50, %s3001_s27  ;;  %795 = vrot.lane.b32.xlu1 %v3248_v50, %s3002_s28  ;;  %v855_v56 = vrot.slane %v3248_v50, 2  ;;  %v902_v63 = vrot.slane %v3248_v50, 6 }
 0x275   : > { %v2758_v54 = vpack.i.bf16 %v790_v53, %v3251_v52  ;;  %v856_v57 = vrot.slane %v3251_v52, 2  ;;  %v857_v58 = vrot.slane %v790_v53, 2  ;;  %v903_v60 = vrot.slane %v3251_v52, 6 }
 0x276   : > { %v904_v61 = vrot.slane %v790_v53, 6  ;;  %v792_v37 = vsel %vm3166_vm3, %v3251_v52, 0.0  ;;  %v791_v45 = vsel %vm3162_vm2, %v3248_v50, 0.0 }
 0x277   : > { %v687_v55 = vpop.permute.xlu1 %686  ;;  %v2778_v59 = vpack.i.bf16 %v857_v58, %v856_v57 }
 0x278   : > { %819 = vrot.lane.b32.xlu1 %v3248_v50, %s3003_s29  ;;  %2759 = vrot.lane.b32.xlu0 %v2758_v54, %s3002_s28  ;;  %v2788_v62 = vpack.i.bf16 %v904_v61, %v903_v60 }
 0x279   : > { %2545 = vmatmul.mubr.msk.f32.vlgmr.msra.gmra.mrb[0].mxu0 %vm3863_vm15, %v687_v55  ;;  %vm919_vm15 = vcmask 1041408  }
 0x27a   : > { %1007 = vmatprep.mubr.f32.mxu0 %v3008_v12 }
 0x27c   : > { %2764 = vrot.lane.b32.xlu1 %v2758_v54, %s3001_s27  ;;  %2769 = vrot.lane.b32.xlu0 %v2758_v54, %s3003_s29 }
 0x280   : > { %858 = vrot.lane.b32.xlu1 %v855_v56, %s3004_s14  ;;  %2774 = vrot.lane.b32.xlu0 %v2758_v54, %s3006_s17 }
 0x284   : > { %880 = vrot.lane.b32.xlu1 %v3248_v50, %s3006_s17  ;;  %2779 = vrot.lane.b32.xlu0 %v2778_v59, %s3004_s14 }
 0x288   : > { %2789 = vrot.lane.b32.xlu1 %v2788_v62, %s3007_s21  ;;  %2784 = vrot.lane.b32.xlu0 %v2758_v54, %s3005_s16 }
 0x28c   : > { %845 = vrot.lane.b32.xlu1 %v3251_v52, %s3878_s25  ;;  %831 = vrot.lane.b32.xlu0 %v3248_v50, %s3005_s16 }
 0x290   : > { %843 = vrot.lane.b32.xlu1 %v3248_v50, %s3878_s25  ;;  %905 = vrot.lane.b32.xlu0 %v902_v63, %s3007_s21 }
 0x294   : > { %847 = vrot.lane.b32.xlu0 %v790_v53, %s3878_s25 }
 0x298   : > { %930 = vperm.xlu0 %2793, %v776_v0  }
 0x2e6   : > { %v808_v1 = vpop.permute.xlu0 %807  ;;  %v796_v2 = vpop.permute.xlu1 %795 }
 0x2ea   : > { %v820_v3 = vpop.permute.xlu1 %819  ;;  %v2760_v4 = vpop.permute.xlu0 %2759 }
 0x2eb   : > { %v2762_v5 = vunpack.i.h.bf16 %v2760_v4  ;;  %v2761_v6 = vunpack.i.l.bf16 %v2760_v4 }
 0x2ed   : > { %v802_v14 = vsel %vm483_vm8, %v2761_v6, %v2762_v5  ;;  %v801_v16 = vsel %vm483_vm8, %v796_v2, %v2761_v6 }
 0x2ee   : > { %v2765_v7 = vpop.permute.xlu1 %2764  ;;  %v2770_v8 = vpop.permute.xlu0 %2769  ;;  %v806_v23 = vsel %vm3170_vm4, %v802_v14, 0.0  ;;  %v805_v29 = vsel %vm3174_vm5, %v801_v16, 0.0 }
 0x2ef   : > { %v2767_v9 = vunpack.i.h.bf16 %v2765_v7  ;;  %v2766_v10 = vunpack.i.l.bf16 %v2765_v7  ;;  %v2772_v11 = vunpack.i.h.bf16 %v2770_v8  ;;  %v2771_v13 = vunpack.i.l.bf16 %v2770_v8 }
 0x2f0   : > { %v871_v38 = vrot.slane %v806_v23, 4  ;;  %v870_v43 = vrot.slane %v805_v29, 4 }
 0x2f1   : > { %v814_v15 = vsel %vm496_vm7, %v2766_v10, %v2767_v9  ;;  %v813_v17 = vsel %vm496_vm7, %v808_v1, %v2766_v10  ;;  %v826_v19 = vsel %vm3867_vm9, %v2771_v13, %v2772_v11  ;;  %v825_v22 = vsel %vm3867_vm9, %v820_v3, %v2771_v13 }
 0x2f2   : > { %v818_v18 = vsel %vm3166_vm3, %v814_v15, 0.0  ;;  %v859_v20 = vpop.permute.xlu1 %858  ;;  %v2775_v21 = vpop.permute.xlu0 %2774  ;;  %v830_v24 = vsel %vm3170_vm4, %v826_v19, 0.0  ;;  %v817_v30 = vsel %vm3162_vm2, %v813_v17, 0.0  ;;  %v829_v35 = vsel %vm3174_vm5, %v825_v22, 0.0 }
 0x2f3   : > { %v2777_v25 = vunpack.i.h.bf16 %v2775_v21  ;;  %v2776_v27 = vunpack.i.l.bf16 %v2775_v21  ;;  %v877_v33 = vrot.slane %v818_v18, 6  ;;  %v893_v39 = vrot.slane %v830_v24, 2 }
 0x2f4   : > { %v876_v44 = vrot.slane %v817_v30, 6  ;;  %v892_v47 = vrot.slane %v829_v35, 2  ;;  %v771_v30 = vld [vmem:[%s3853_s3] sm:$0x3f] }
 0x2f5   : > { %v887_v46 = vsel %vm3866_vm10, %v2776_v27, %v2777_v25  ;;  %v921_v51 = vsel %vm919_vm15, %v871_v38, %v877_v33 }
 0x2f6   : > { %v881_v34 = vpop.permute.xlu1 %880  ;;  %v2780_v36 = vpop.permute.xlu0 %2779  ;;  %v923_v60 = vsel %vm691_vm14, %v887_v46, %v893_v39  ;;  %v920_v9 = vsel %vm919_vm15, %v870_v43, %v876_v44 }
 0x2f7   : > { %v2782_v40 = vunpack.i.h.bf16 %v2780_v36  ;;  %v2781_v42 = vunpack.i.l.bf16 %v2780_v36  ;;  %v886_v50 = vsel %vm3866_vm10, %v881_v34, %v2776_v27  ;;  %v2598_v6 = vpack.c.bf16 %v923_v60, %v921_v51 }
 0x2f8   : > { %v922_v2 = vsel %vm691_vm14, %v886_v50, %v892_v47 }
 0x2f9   : > { %v864_v48 = vsel %vm3865_vm11, %v859_v20, %v2781_v42  ;;  %v865_v49 = vsel %vm3865_vm11, %v2781_v42, %v2782_v40  ;;  %v2600_v13 = vpack.c.bf16 %v922_v2, %v920_v9 }
 0x2fa   : > { %v2790_v52 = vpop.permute.xlu1 %2789  ;;  %v2785_v53 = vpop.permute.xlu0 %2784  ;;  %v916_v54 = vsel %vm691_vm14, %v792_v37, %v865_v49  ;;  %v918_v55 = vsel %vm376_vm1, %v865_v49, %v871_v38  ;;  %v915_v56 = vsel %vm691_vm14, %v791_v45, %v864_v48  ;;  %v917_v57 = vsel %vm376_vm1, %v864_v48, %v870_v43 }
 0x2fb   : > { %v2787_v58 = vunpack.i.h.bf16 %v2785_v53  ;;  %v2786_v59 = vunpack.i.l.bf16 %v2785_v53  ;;  %v2792_v61 = vunpack.i.h.bf16 %v2790_v52  ;;  %v2791_v62 = vunpack.i.l.bf16 %v2790_v52 }
 0x2fc   : > { %v2594_v63 = vpack.c.bf16 %v918_v55, %v916_v54  ;;  %v2596_v0 = vpack.c.bf16 %v917_v57, %v915_v56  ;;  %v777_v57 = vld [vmem:[%s3854_s4 + $0x8] sm:$0x3f] }
 0x2fd   : > { %v838_v1 = vsel %vm522_vm6, %v2786_v59, %v2787_v58  ;;  %v912_v10 = vsel %vm3864_vm12, %v2791_v62, %v2792_v61 }
 0x2fe   : > { %v842_v3 = vsel %vm3166_vm3, %v838_v1, 0.0  ;;  %2595 = vmatprep.subr.bf16.mxu0 %v2594_v63  ;;  %v846_v4 = vpop.permute.xlu1 %845  ;;  %v832_v5 = vpop.permute.xlu0 %831 }
 0x2ff   : > { %v899_v7 = vrot.slane %v842_v3, 4  ;;  %v837_v8 = vsel %vm522_vm6, %v832_v5, %v2786_v59  ;;  %2597 = vmatpush1.bf16.msra.mxu0 %v2596_v0 }
 0x300   : > { %v841_v11 = vsel %vm3162_vm2, %v837_v8, 0.0  ;;  %2599 = vmatprep.subr.bf16.mxu0 %v2598_v6 }
 0x301   : > { %v898_v14 = vrot.slane %v841_v11, 4  ;;  %v925_v15 = vsel %vm376_vm1, %v893_v39, %v899_v7  ;;  %v927_v16 = vsel %vm919_vm15, %v899_v7, %v912_v10 }
 0x302   : > { %v906_v17 = vpop.permute.xlu0 %905  ;;  %v2602_v18 = vpack.c.bf16 %v927_v16, %v925_v15  ;;  %v844_v21 = vpop.permute.xlu1 %843 }
 0x303   : > { %v911_v19 = vsel %vm3864_vm12, %v906_v17, %v2791_v62  ;;  %v924_v20 = vsel %vm376_vm1, %v892_v47, %v898_v14  ;;  %2601 = vmatpush1.bf16.msra.mxu0 %v2600_v13  ;;  %v849_v25 = vsel %vm535_vm13, %v844_v21, %v846_v4  ;;  %vm933_vm12 = vcmask 441344  }
 0x304   : > { %v926_v22 = vsel %vm919_vm15, %v898_v14, %v911_v19  ;;  %2603 = vmatprep.subr.bf16.mxu0 %v2602_v18  ;;  %v853_v33 = vsel %vm3174_vm5, %v849_v25, 0.0 }
 0x305   : > { %v2604_v23 = vpack.c.bf16 %v926_v22, %v924_v20 }
 0x306   : > { %v848_v24 = vpop.permute.xlu0 %847 }
 0x307   : > { %v850_v27 = vsel %vm535_vm13, %v846_v4, %v848_v24  ;;  %2605 = vmatpush1.bf16.msra.mxu0 %v2604_v23 }
 0x308   : > { %v854_v29 = vsel %vm3170_vm4, %v850_v27, 0.0 }
 0x309   : > { %2546 = vmatprep.subr.msk.mxu0 %vm691_vm14, %v854_v29 }
 0x30b   : > { %2547 = vmatpush1.msk.msra.mxu0 %vm691_vm14, %v853_v33 }
 0x30c   : > { %2548 = vmatmul.mubr.msk.f32.vlgmr.msra.gmra.mrb[2].mxu0 %vm933_vm12, %v771_v30 }
 0x30d   : > { %1090 = vmatprep.mubr.f32.mxu0 %v3008_v12 }
 0x317   : > { %v931_v34 = vpop.permute.xlu0 %930 }
 0x3df   : > { %v1009_v35 = vpop.f32.mrb[2].mxu0 }
 0x3e0   : > { %v1010_v36 = vadd.f32 %v1009_v35, %v931_v34  ;;  %v1011_v37 = vpop.f32.mrb[3].mxu0 }
 0x3e1   : > { %v1012_v38 = vadd.f32 %v1011_v37, %v931_v34 }
 0x3e2   : > { %v1014_v39 = vmax.f32 %v1010_v36, 0.0 }
 0x3e3   : > { %v1015_v40 = vmax.f32 %v1012_v38, 0.0 }
 0x3e4   : > { %1099 = vrot.lane.b32.xlu1 %v1014_v39, %s3000_s26 }
 0x3e5   : > { %2549 = vmatprep.subr.msk.mxu0 %vm691_vm14, %v1015_v40 }
 0x3e6   : > { %2550 = vmatpush1.msk.msra.mxu0 %vm691_vm14, %v1014_v39 }
 0x3e8   : > { %1101 = vrot.lane.b32.xlu1 %v1015_v40, %s3000_s26 }
 0x456   : > { %v1100_v42 = vpop.permute.xlu1 %1099 }
 0x457   : > { %v3354_v43 = vsel %vm458_vm0, 0.0, %v1100_v42 }
 0x458   : > { %1125 = vrot.lane.b32.xlu0 %v3354_v43, %s3001_s27  ;;  %1113 = vrot.lane.b32.xlu1 %v3354_v43, %s3002_s28  ;;  %v1173_v51 = vrot.slane %v3354_v43, 2  ;;  %v1220_v55 = vrot.slane %v3354_v43, 6  ;;  %v1109_v33 = vsel %vm3162_vm2, %v3354_v43, 0.0 }
 0x45a   : > { %v1102_v44 = vpop.permute.xlu1 %1101 }
 0x45b   : > { %v3361_v45 = vsel %vm458_vm0, %v1100_v42, %v1102_v44  ;;  %v1108_v46 = vsel %vm458_vm0, %v1102_v44, 0.0 }
 0x45c   : > { %1137 = vrot.lane.b32.xlu1 %v3354_v43, %s3003_s29  ;;  %v2794_v47 = vpack.i.bf16 %v1108_v46, %v3361_v45  ;;  %v1174_v48 = vrot.slane %v3361_v45, 2  ;;  %v1175_v49 = vrot.slane %v1108_v46, 2  ;;  %v1221_v53 = vrot.slane %v3361_v45, 6 }
 0x45d   : > { %v1222_v54 = vrot.slane %v1108_v46, 6  ;;  %v1110_v30 = vsel %vm3166_vm3, %v3361_v45, 0.0 }
 0x45e   : > { %2795 = vrot.lane.b32.xlu0 %v2794_v47, %s3002_s28  ;;  %v2819_v52 = vpack.i.bf16 %v1175_v49, %v1174_v48 }
 0x45f   : > { %v2824_v56 = vpack.i.bf16 %v1222_v54, %v1221_v53 }
 0x460   : > { %2800 = vrot.lane.b32.xlu1 %v2794_v47, %s3001_s27 }
 0x462   : > { %2805 = vrot.lane.b32.xlu0 %v2794_v47, %s3003_s29 }
 0x464   : > { %2815 = vrot.lane.b32.xlu1 %v2794_v47, %s3005_s16 }
 0x466   : > { %2810 = vrot.lane.b32.xlu0 %v2794_v47, %s3006_s17 }
 0x468   : > { %1176 = vrot.lane.b32.xlu1 %v1173_v51, %s3004_s14 }
 0x46a   : > { %2820 = vrot.lane.b32.xlu0 %v2819_v52, %s3004_s14 }
 0x46c   : > { %1149 = vrot.lane.b32.xlu1 %v3354_v43, %s3005_s16 }
 0x46e   : > { %1198 = vrot.lane.b32.xlu0 %v3354_v43, %s3006_s17 }
 0x470   : > { %1223 = vrot.lane.b32.xlu1 %v1220_v55, %s3007_s21 }
 0x472   : > { %2825 = vrot.lane.b32.xlu0 %v2824_v56, %s3007_s21 }
 0x474   : > { %1165 = vrot.lane.b32.xlu1 %v1108_v46, %s3878_s25 }
 0x476   : > { %1163 = vrot.lane.b32.xlu0 %v3361_v45, %s3878_s25 }
 0x478   : > { %1247 = vperm.xlu1 %2757, %v777_v57  }
 0x47a   : > { %1161 = vrot.lane.b32.xlu0 %v3354_v43, %s3878_s25 }
 0x4ca   : > { %v1114_v50 = vpop.permute.xlu1 %1113  ;;  %v1126_v58 = vpop.permute.xlu0 %1125 }
 0x4ce   : > { %v1138_v59 = vpop.permute.xlu1 %1137 }
 0x4d0   : > { %v2796_v60 = vpop.permute.xlu0 %2795 }
 0x4d1   : > { %v2798_v62 = vunpack.i.h.bf16 %v2796_v60  ;;  %v2797_v63 = vunpack.i.l.bf16 %v2796_v60 }
 0x4d2   : > { %v2801_v61 = vpop.permute.xlu1 %2800 }
 0x4d3   : > { %v2803_v0 = vunpack.i.h.bf16 %v2801_v61  ;;  %v2802_v1 = vunpack.i.l.bf16 %v2801_v61  ;;  %v1119_v6 = vsel %vm483_vm8, %v1114_v50, %v2797_v63  ;;  %v1120_v7 = vsel %vm483_vm8, %v2797_v63, %v2798_v62 }
 0x4d4   : > { %v2806_v2 = vpop.permute.xlu0 %2805  ;;  %v1123_v18 = vsel %vm3174_vm5, %v1119_v6, 0.0  ;;  %v1124_v21 = vsel %vm3170_vm4, %v1120_v7, 0.0 }
 0x4d5   : > { %v2808_v3 = vunpack.i.h.bf16 %v2806_v2  ;;  %v2807_v4 = vunpack.i.l.bf16 %v2806_v2  ;;  %v1131_v8 = vsel %vm496_vm7, %v1126_v58, %v2802_v1  ;;  %v1132_v9 = vsel %vm496_vm7, %v2802_v1, %v2803_v0 }
 0x4d6   : > { %v2816_v5 = vpop.permute.xlu1 %2815  ;;  %v1135_v22 = vsel %vm3162_vm2, %v1131_v8, 0.0  ;;  %v1136_v23 = vsel %vm3166_vm3, %v1132_v9, 0.0  ;;  %v1188_v34 = vrot.slane %v1123_v18, 4  ;;  %v1189_v38 = vrot.slane %v1124_v21, 4  ;;  %v772_v21 = vld [vmem:[%s3853_s3 + $0x8] sm:$0x3f] }
 0x4d7   : > { %v1143_v10 = vsel %vm3867_vm9, %v1138_v59, %v2807_v4  ;;  %v1144_v11 = vsel %vm3867_vm9, %v2807_v4, %v2808_v3  ;;  %v2818_v13 = vunpack.i.h.bf16 %v2816_v5  ;;  %v2817_v14 = vunpack.i.l.bf16 %v2816_v5 }
 0x4d8   : > { %v2811_v15 = vpop.permute.xlu0 %2810  ;;  %v1148_v16 = vsel %vm3170_vm4, %v1144_v11, 0.0  ;;  %v1147_v24 = vsel %vm3174_vm5, %v1143_v10, 0.0  ;;  %v1194_v39 = vrot.slane %v1135_v22, 6  ;;  %v1195_v40 = vrot.slane %v1136_v23, 6 }
 0x4d9   : > { %v2813_v17 = vunpack.i.h.bf16 %v2811_v15  ;;  %v2812_v19 = vunpack.i.l.bf16 %v2811_v15  ;;  %v1211_v25 = vrot.slane %v1148_v16, 2  ;;  %v1156_v27 = vsel %vm522_vm6, %v2817_v14, %v2818_v13 }
 0x4da   : > { %v1177_v20 = vpop.permute.xlu1 %1176  ;;  %v1210_v42 = vrot.slane %v1147_v24, 2  ;;  %v1160_v46 = vsel %vm3166_vm3, %v1156_v27, 0.0  ;;  %v1238_v59 = vsel %vm919_vm15, %v1189_v38, %v1195_v40  ;;  %v1237_v1 = vsel %vm919_vm15, %v1188_v34, %v1194_v39 }
 0x4db   : > { %v1205_v35 = vsel %vm3866_vm10, %v2812_v19, %v2813_v17  ;;  %v1217_v62 = vrot.slane %v1160_v46, 4 }
 0x4dc   : > { %v2821_v29 = vpop.permute.xlu0 %2820  ;;  %v1240_v53 = vsel %vm691_vm14, %v1205_v35, %v1211_v25 }
 0x4dd   : > { %v2823_v36 = vunpack.i.h.bf16 %v2821_v29  ;;  %v2822_v37 = vunpack.i.l.bf16 %v2821_v29  ;;  %v2610_v61 = vpack.c.bf16 %v1240_v53, %v1238_v59  ;;  %v1242_v10 = vsel %vm376_vm1, %v1211_v25, %v1217_v62 }
 0x4de   : > { %v1150_v44 = vpop.permute.xlu1 %1149 }
 0x4df   : > { %v1182_v47 = vsel %vm3865_vm11, %v1177_v20, %v2822_v37  ;;  %v1183_v45 = vsel %vm3865_vm11, %v2822_v37, %v2823_v36  ;;  %v1155_v48 = vsel %vm522_vm6, %v1150_v44, %v2817_v14  ;;  %vm3879_vm11 = vcmask 777216  }
 0x4e0   : > { %v1199_v43 = vpop.permute.xlu0 %1198  ;;  %v1234_v49 = vsel %vm691_vm14, %v1110_v30, %v1183_v45  ;;  %v1236_v51 = vsel %vm376_vm1, %v1183_v45, %v1189_v38  ;;  %v1233_v52 = vsel %vm691_vm14, %v1109_v33, %v1182_v47  ;;  %v1159_v54 = vsel %vm3162_vm2, %v1155_v48, 0.0 }
 0x4e1   : > { %v1204_v55 = vsel %vm3866_vm10, %v1199_v43, %v2812_v19  ;;  %v2606_v56 = vpack.c.bf16 %v1236_v51, %v1234_v49  ;;  %v1235_v57 = vsel %vm376_vm1, %v1182_v47, %v1188_v34  ;;  %v1216_v63 = vrot.slane %v1159_v54, 4  ;;  %vm3880_vm10 = vmmov %vm3879_vm11  ;;  %v778_v43 = vld [vmem:[%s3854_s4 + $0x10] sm:$0x3f] }
 0x4e2   : > { %v1224_v50 = vpop.permute.xlu1 %1223  ;;  %v2608_v58 = vpack.c.bf16 %v1235_v57, %v1233_v52  ;;  %v1239_v60 = vsel %vm691_vm14, %v1204_v55, %v1210_v42 }
 0x4e3   : > { %2607 = vmatprep.subr.bf16.mxu1 %v2606_v56  ;;  %v2612_v4 = vpack.c.bf16 %v1239_v60, %v1237_v1  ;;  %v1241_v7 = vsel %vm376_vm1, %v1210_v42, %v1216_v63 }
 0x4e4   : > { %v2826_v0 = vpop.permute.xlu0 %2825  ;;  %2609 = vmatpush1.bf16.msra.mxu1 %v2608_v58 }
 0x4e5   : > { %v2828_v2 = vunpack.i.h.bf16 %v2826_v0  ;;  %v2827_v3 = vunpack.i.l.bf16 %v2826_v0  ;;  %2611 = vmatprep.subr.bf16.mxu1 %v2610_v61 }
 0x4e6   : > { %v1166_v8 = vpop.permute.xlu1 %1165 }
 0x4e7   : > { %v1229_v5 = vsel %vm3879_vm11, %v1224_v50, %v2827_v3  ;;  %v1230_v6 = vsel %vm3880_vm10, %v2827_v3, %v2828_v2  ;;  %vm3881_vm10 = vcmask 908288   ;;  %vm3882_vm11 = vcmask 1039360  }
 0x4e8   : > { %v1164_v9 = vpop.permute.xlu0 %1163  ;;  %2613 = vmatpush1.bf16.msra.mxu1 %v2612_v4  ;;  %v1244_v11 = vsel %vm919_vm15, %v1217_v62, %v1230_v6  ;;  %v1243_v13 = vsel %vm919_vm15, %v1216_v63, %v1229_v5 }
 0x4e9   : > { %v1168_v14 = vsel %vm535_vm13, %v1164_v9, %v1166_v8  ;;  %v2614_v15 = vpack.c.bf16 %v1244_v11, %v1242_v10  ;;  %v2616_v16 = vpack.c.bf16 %v1243_v13, %v1241_v7 }
 0x4ea   : > { %v1172_v17 = vsel %vm3170_vm4, %v1168_v14, 0.0 }
 0x4eb   : > { %2615 = vmatprep.subr.bf16.mxu1 %v2614_v15 }
 0x4ec   : > { %v1162_v18 = vpop.permute.xlu0 %1161  ;;  %2617 = vmatpush1.bf16.msra.mxu1 %v2616_v16 }
 0x4ed   : > { %v1167_v19 = vsel %vm535_vm13, %v1162_v18, %v1164_v9  ;;  %2552 = vmatprep.subr.msk.mxu1 %vm691_vm14, %v1172_v17 }
 0x4ee   : > { %v1171_v20 = vsel %vm3174_vm5, %v1167_v19, 0.0 }
 0x4f0   : > { %2553 = vmatpush1.msk.msra.mxu1 %vm691_vm14, %v1171_v20 }
 0x4f1   : > { %2554 = vmatmul.mubr.msk.f32.vlgmr.msra.gmra.mrb[2].mxu1 %vm933_vm12, %v772_v21 }
 0x4f2   : > { %1639 = vmatprep.mubr.f32.mxu1 %v3008_v12 }
 0x4f7   : > { %v1248_v22 = vpop.permute.xlu1 %1247 }
 0x5c4   : > { %v1325_v23 = vpop.f32.mrb[2].mxu1 }
 0x5c5   : > { %v3453_v24 = vadd.f32 %v1325_v23, %v1248_v22  ;;  %v1327_v25 = vpop.f32.mrb[3].mxu1 }
 0x5c6   : > { %v1328_v27 = vadd.f32 %v1327_v25, %v1248_v22 }
 0x5c7   : > { %v1330_v29 = vmax.f32 %v3453_v24, 0.0 }
 0x5c8   : > { %v1331_v30 = vmax.f32 %v1328_v27, 0.0 }
 0x5c9   : > { %1415 = vrot.lane.b32.xlu0 %v1330_v29, %s3000_s26 }
 0x5ca   : > { %1417 = vrot.lane.b32.xlu1 %v1331_v30, %s3000_s26  ;;  %2555 = vmatprep.subr.msk.mxu0 %vm691_vm14, %v1331_v30 }
 0x63b   : > { %v1416_v33 = vpop.permute.xlu0 %1415 }
 0x63c   : > { %v3462_v34 = vsel %vm458_vm0, 0.0, %v1416_v33  ;;  %v1418_v35 = vpop.permute.xlu1 %1417 }
 0x63d   : > { %v3465_v36 = vsel %vm458_vm0, %v1416_v33, %v1418_v35  ;;  %v1424_v37 = vsel %vm458_vm0, %v1418_v35, 0.0  ;;  %1441 = vrot.lane.b32.xlu0 %v3462_v34, %s3001_s27  ;;  %1429 = vrot.lane.b32.xlu1 %v3462_v34, %s3002_s28  ;;  %v1489_v42 = vrot.slane %v3462_v34, 2  ;;  %v1536_v45 = vrot.slane %v3462_v34, 6 }
 0x63e   : > { %v2829_v38 = vpack.i.bf16 %v1424_v37, %v3465_v36  ;;  %v1490_v39 = vrot.slane %v3465_v36, 2  ;;  %v1491_v40 = vrot.slane %v1424_v37, 2  ;;  %v1537_v46 = vrot.slane %v3465_v36, 6 }
 0x63f   : > { %v1538_v47 = vrot.slane %v1424_v37, 6  ;;  %v1426_v22 = vsel %vm3166_vm3, %v3465_v36, 0.0  ;;  %v1425_v30 = vsel %vm3162_vm2, %v3462_v34, 0.0 }
 0x640   : > { %v2854_v44 = vpack.i.bf16 %v1491_v40, %v1490_v39 }
 0x641   : > { %1453 = vrot.lane.b32.xlu1 %v3462_v34, %s3003_s29  ;;  %2830 = vrot.lane.b32.xlu0 %v2829_v38, %s3002_s28  ;;  %v2859_v48 = vpack.i.bf16 %v1538_v47, %v1537_v46 }
 0x645   : > { %2835 = vrot.lane.b32.xlu1 %v2829_v38, %s3001_s27  ;;  %2840 = vrot.lane.b32.xlu0 %v2829_v38, %s3003_s29 }
 0x649   : > { %2850 = vrot.lane.b32.xlu1 %v2829_v38, %s3005_s16  ;;  %2845 = vrot.lane.b32.xlu0 %v2829_v38, %s3006_s17 }
 0x64d   : > { %1492 = vrot.lane.b32.xlu1 %v1489_v42, %s3004_s14  ;;  %2855 = vrot.lane.b32.xlu0 %v2854_v44, %s3004_s14 }
 0x651   : > { %1465 = vrot.lane.b32.xlu1 %v3462_v34, %s3005_s16  ;;  %1514 = vrot.lane.b32.xlu0 %v3462_v34, %s3006_s17 }
 0x655   : > { %1539 = vrot.lane.b32.xlu1 %v1536_v45, %s3007_s21  ;;  %2860 = vrot.lane.b32.xlu0 %v2859_v48, %s3007_s21 }
 0x659   : > { %1481 = vrot.lane.b32.xlu1 %v1424_v37, %s3878_s25  ;;  %1479 = vrot.lane.b32.xlu0 %v3465_v36, %s3878_s25 }
 0x65d   : > { %1563 = vperm.xlu1 %2757, %v778_v43   ;;  %1477 = vrot.lane.b32.xlu0 %v3462_v34, %s3878_s25 }
 0x6af   : > { %v1442_v49 = vpop.permute.xlu0 %1441  ;;  %v1430_v51 = vpop.permute.xlu1 %1429 }
 0x6b3   : > { %v1454_v52 = vpop.permute.xlu1 %1453  ;;  %v2831_v53 = vpop.permute.xlu0 %2830 }
 0x6b4   : > { %v2833_v54 = vunpack.i.h.bf16 %v2831_v53  ;;  %v2832_v55 = vunpack.i.l.bf16 %v2831_v53 }
 0x6b6   : > { %v1435_v59 = vsel %vm483_vm8, %v1430_v51, %v2832_v55  ;;  %v1436_v60 = vsel %vm483_vm8, %v2832_v55, %v2833_v54 }
 0x6b7   : > { %v2836_v56 = vpop.permute.xlu1 %2835  ;;  %v2841_v57 = vpop.permute.xlu0 %2840  ;;  %v1439_v6 = vsel %vm3174_vm5, %v1435_v59, 0.0  ;;  %v1440_v7 = vsel %vm3170_vm4, %v1436_v60, 0.0 }
 0x6b8   : > { %v2838_v50 = vunpack.i.h.bf16 %v2836_v56  ;;  %v2837_v58 = vunpack.i.l.bf16 %v2836_v56  ;;  %v2843_v61 = vunpack.i.h.bf16 %v2841_v57  ;;  %v2842_v62 = vunpack.i.l.bf16 %v2841_v57 }
 0x6b9   : > { %v1505_v18 = vrot.slane %v1440_v7, 4  ;;  %v1504_v33 = vrot.slane %v1439_v6, 4 }
 0x6ba   : > { %v1447_v63 = vsel %vm496_vm7, %v1442_v49, %v2837_v58  ;;  %v1448_v0 = vsel %vm496_vm7, %v2837_v58, %v2838_v50  ;;  %v1459_v2 = vsel %vm3867_vm9, %v1454_v52, %v2842_v62  ;;  %v1460_v3 = vsel %vm3867_vm9, %v2842_v62, %v2843_v61  ;;  %vm3883_vm9 = vmmov %vm3882_vm11 }
 0x6bb   : > { %v1452_v1 = vsel %vm3166_vm3, %v1448_v0, 0.0  ;;  %v2851_v4 = vpop.permute.xlu1 %2850  ;;  %v2846_v5 = vpop.permute.xlu0 %2845  ;;  %v1464_v8 = vsel %vm3170_vm4, %v1460_v3, 0.0  ;;  %v1451_v9 = vsel %vm3162_vm2, %v1447_v63, 0.0  ;;  %v1463_v14 = vsel %vm3174_vm5, %v1459_v2, 0.0 }
 0x6bc   : > { %v1511_v10 = vrot.slane %v1452_v1, 6  ;;  %v2853_v11 = vunpack.i.h.bf16 %v2851_v4  ;;  %v2852_v13 = vunpack.i.l.bf16 %v2851_v4  ;;  %v1527_v15 = vrot.slane %v1464_v8, 2 }
 0x6bd   : > { %v2848_v16 = vunpack.i.h.bf16 %v2846_v5  ;;  %v2847_v17 = vunpack.i.l.bf16 %v2846_v5  ;;  %v1510_v35 = vrot.slane %v1451_v9, 6  ;;  %v1526_v37 = vrot.slane %v1463_v14, 2 }
 0x6be   : > { %v1472_v19 = vsel %vm522_vm6, %v2852_v13, %v2853_v11  ;;  %v1554_v38 = vsel %vm919_vm15, %v1505_v18, %v1511_v10 }
 0x6bf   : > { %v1493_v20 = vpop.permute.xlu1 %1492  ;;  %v2856_v21 = vpop.permute.xlu0 %2855  ;;  %v1521_v23 = vsel %vm3881_vm10, %v2847_v17, %v2848_v16  ;;  %v1476_v39 = vsel %vm3166_vm3, %v1472_v19, 0.0  ;;  %v1553_v59 = vsel %vm919_vm15, %v1504_v33, %v1510_v35 }
 0x6c0   : > { %v2858_v25 = vunpack.i.h.bf16 %v2856_v21  ;;  %v2857_v27 = vunpack.i.l.bf16 %v2856_v21  ;;  %v1556_v42 = vsel %vm691_vm14, %v1521_v23, %v1527_v15  ;;  %v1533_v56 = vrot.slane %v1476_v39, 4 }
 0x6c1   : > { %v2622_v55 = vpack.c.bf16 %v1556_v42, %v1554_v38 }
 0x6c2   : > { %v1498_v40 = vsel %vm3882_vm11, %v1493_v20, %v2857_v27  ;;  %v1499_v36 = vsel %vm3883_vm9, %v2857_v27, %v2858_v25  ;;  %vm3884_vm9 = vcmask 777216   ;;  %v1558_v4 = vsel %vm376_vm1, %v1527_v15, %v1533_v56  ;;  %v773_v15 = vld [vmem:[%s3853_s3 + $0x10] sm:$0x3f] }
 0x6c3   : > { %v1466_v44 = vpop.permute.xlu1 %1465  ;;  %v1515_v46 = vpop.permute.xlu0 %1514  ;;  %v1550_v47 = vsel %vm691_vm14, %v1426_v22, %v1499_v36  ;;  %v1552_v34 = vsel %vm376_vm1, %v1499_v36, %v1505_v18  ;;  %v1549_v45 = vsel %vm691_vm14, %v1425_v30, %v1498_v40  ;;  %v1551_v48 = vsel %vm376_vm1, %v1498_v40, %v1504_v33  ;;  %vm3885_vm11 = vmmov %vm3884_vm9 }
 0x6c4   : > { %v1471_v43 = vsel %vm522_vm6, %v1466_v44, %v2852_v13  ;;  %v1520_v49 = vsel %vm3881_vm10, %v1515_v46, %v2847_v17  ;;  %v2618_v51 = vpack.c.bf16 %v1552_v34, %v1550_v47  ;;  %v2620_v52 = vpack.c.bf16 %v1551_v48, %v1549_v45  ;;  %v779_v47 = vld [vmem:[%s3854_s4 + $0x18] sm:$0x3f] }
 0x6c5   : > { %v1475_v53 = vsel %vm3162_vm2, %v1471_v43, 0.0  ;;  %v1555_v54 = vsel %vm691_vm14, %v1520_v49, %v1526_v37  ;;  %vm3886_vm10 = vcmask 48128  }
 0x6c6   : > { %2619 = vmatprep.subr.bf16.mxu1 %v2618_v51  ;;  %v1532_v57 = vrot.slane %v1475_v53, 4  ;;  %v2624_v62 = vpack.c.bf16 %v1555_v54, %v1553_v59 }
 0x6c7   : > { %v1540_v50 = vpop.permute.xlu1 %1539  ;;  %v2861_v58 = vpop.permute.xlu0 %2860  ;;  %2621 = vmatpush1.bf16.msra.mxu1 %v2620_v52 }
 0x6c8   : > { %v2863_v60 = vunpack.i.h.bf16 %v2861_v58  ;;  %v2862_v61 = vunpack.i.l.bf16 %v2861_v58  ;;  %2623 = vmatprep.subr.bf16.mxu1 %v2622_v55  ;;  %v1557_v1 = vsel %vm376_vm1, %v1526_v37, %v1532_v57 }
 0x6ca   : > { %v1545_v63 = vsel %vm3884_vm9, %v1540_v50, %v2862_v61  ;;  %v1546_v0 = vsel %vm3885_vm11, %v2862_v61, %v2863_v60  ;;  %vm3887_vm9 = vmmov %vm3886_vm10 }
 0x6cb   : > { %v1482_v2 = vpop.permute.xlu1 %1481  ;;  %v1480_v3 = vpop.permute.xlu0 %1479  ;;  %2625 = vmatpush1.bf16.msra.mxu1 %v2624_v62  ;;  %v1560_v5 = vsel %vm919_vm15, %v1533_v56, %v1546_v0  ;;  %v1559_v6 = vsel %vm919_vm15, %v1532_v57, %v1545_v63  ;;  %vm3888_vm11 = vmmov %vm3887_vm9 }
 0x6cc   : > { %v1484_v7 = vsel %vm535_vm13, %v1480_v3, %v1482_v2  ;;  %v2626_v8 = vpack.c.bf16 %v1560_v5, %v1558_v4  ;;  %v2628_v9 = vpack.c.bf16 %v1559_v6, %v1557_v1 }
 0x6cd   : > { %v1488_v10 = vsel %vm3170_vm4, %v1484_v7, 0.0 }
 0x6ce   : > { %2627 = vmatprep.subr.bf16.mxu1 %v2626_v8 }
 0x6cf   : > { %v1478_v11 = vpop.permute.xlu0 %1477  ;;  %2629 = vmatpush1.bf16.msra.mxu1 %v2628_v9 }
 0x6d0   : > { %v1483_v13 = vsel %vm535_vm13, %v1478_v11, %v1480_v3  ;;  %2558 = vmatprep.subr.msk.mxu1 %vm691_vm14, %v1488_v10 }
 0x6d1   : > { %v1487_v14 = vsel %vm3174_vm5, %v1483_v13, 0.0 }
 0x6d3   : > { %2559 = vmatpush1.msk.msra.mxu1 %vm691_vm14, %v1487_v14 }
 0x6d4   : > { %2560 = vmatmul.mubr.msk.f32.vlgmr.msra.gmra.mrb[4].mxu1 %vm933_vm12, %v773_v15 }
 0x6d5   : > { %2271 = vmatprep.mubr.f32.mxu1 %v3008_v12 }
 0x6dc   : > { %v1564_v16 = vpop.permute.xlu1 %1563 }
 0x7a7   : > { %v1641_v17 = vpop.f32.mrb[4].mxu1 }
 0x7a8   : > { %v1642_v18 = vadd.f32 %v1641_v17, %v1564_v16  ;;  %v1643_v19 = vpop.f32.mrb[5].mxu1 }
 0x7a9   : > { %v1644_v20 = vadd.f32 %v1643_v19, %v1564_v16 }
 0x7aa   : > { %v1646_v21 = vmax.f32 %v1642_v18, 0.0 }
 0x7ab   : > { %v1647_v22 = vmax.f32 %v1644_v20, 0.0 }
 0x7ac   : > { %1731 = vrot.lane.b32.xlu0 %v1646_v21, %s3000_s26 }
 0x7ad   : > { %1733 = vrot.lane.b32.xlu1 %v1647_v22, %s3000_s26 }
 0x7b0   : > { %1016 = vrot.lane.b32.xlu0 %v3237_v41, %s3012_s23 }
 0x7b1   : > { %1332 = vrot.lane.b32.xlu1 %v3237_v41, %s3001_s27 }
 0x7b5   : > { %1648 = vrot.lane.b32.xlu1 %v3237_v41, %s3013_s24 }
 0x81e   : > { %v1732_v23 = vpop.permute.xlu0 %1731 }
 0x81f   : > { %v3568_v25 = vsel %vm458_vm0, 0.0, %v1732_v23  ;;  %v1734_v27 = vpop.permute.xlu1 %1733 }
 0x820   : > { %v3571_v30 = vsel %vm458_vm0, %v1732_v23, %v1734_v27  ;;  %v1740_v33 = vsel %vm458_vm0, %v1734_v27, 0.0  ;;  %1757 = vrot.lane.b32.xlu0 %v3568_v25, %s3001_s27  ;;  %1745 = vrot.lane.b32.xlu1 %v3568_v25, %s3002_s28  ;;  %v1805_v38 = vrot.slane %v3568_v25, 2  ;;  %v1852_v46 = vrot.slane %v3568_v25, 6 }
 0x821   : > { %v2864_v35 = vpack.i.bf16 %v1740_v33, %v3571_v30  ;;  %v1806_v24 = vrot.slane %v3571_v30, 2  ;;  %v1853_v39 = vrot.slane %v3571_v30, 6  ;;  %v1854_v40 = vrot.slane %v1740_v33, 6 }
 0x822   : > { %v1017_v37 = vpop.permute.xlu0 %1016  ;;  %v1742_v19 = vsel %vm3166_vm3, %v3571_v30, 0.0  ;;  %v1741_v20 = vsel %vm3162_vm2, %v3568_v25, 0.0 }
 0x823   : > { %2551 = vmatmul.mubr.msk.f32.vlgmr.msra.gmra.mrb[0].mxu0 %vm3886_vm10, %v1017_v37  ;;  %v1333_v41 = vpop.permute.xlu1 %1332  ;;  %v2894_v42 = vpack.i.bf16 %v1854_v40, %v1853_v39  ;;  %vm3889_vm10 = vcmask 900096  }
 0x824   : > { %2556 = vmatpush1.msk.msra.mxu0 %vm691_vm14, %v1330_v29  ;;  %1769 = vrot.lane.b32.xlu1 %v3568_v25, %s3003_s29  ;;  %v1807_v29 = vrot.slane %v1740_v33, 2 }
 0x825   : > { %2865 = vrot.lane.b32.xlu0 %v2864_v35, %s3002_s28  ;;  %2561 = vmatprep.subr.msk.mxu0 %vm691_vm14, %v1647_v22 }
 0x826   : > { %1406 = vmatprep.mubr.f32.mxu0 %v3008_v12  ;;  %v2884_v36 = vpack.i.bf16 %v1807_v29, %v1806_v24 }
 0x827   : > { %v1649_v44 = vpop.permute.xlu1 %1648 }
 0x828   : > { %2870 = vrot.lane.b32.xlu1 %v2864_v35, %s3001_s27 }
 0x829   : > { %2875 = vrot.lane.b32.xlu0 %v2864_v35, %s3003_s29 }
 0x82b   : > { %2557 = vmatmul.mubr.msk.f32.vlgmr.msra.gmra.mrb[0].mxu0 %vm3887_vm9, %v1333_v41  ;;  %vm3890_vm9 = vmmov %vm3889_vm10 }
 0x82c   : > { %2562 = vmatpush1.msk.msra.mxu0 %vm691_vm14, %v1646_v21  ;;  %1808 = vrot.lane.b32.xlu1 %v1805_v38, %s3004_s14 }
 0x82d   : > { %2880 = vrot.lane.b32.xlu0 %v2864_v35, %s3006_s17  ;;  %1722 = vmatprep.mubr.f32.mxu0 %v3008_v12 }
 0x830   : > { %1830 = vrot.lane.b32.xlu1 %v3568_v25, %s3006_s17 }
 0x831   : > { %2885 = vrot.lane.b32.xlu0 %v2884_v36, %s3004_s14 }
 0x833   : > { %2563 = vmatmul.mubr.msk.f32.vlgmr.msra.gmra.mrb[0].mxu0 %vm3888_vm11, %v1649_v44  ;;  %vm3891_vm11 = vcmask 908288  }
 0x834   : > { %2895 = vrot.lane.b32.xlu1 %v2894_v42, %s3007_s21  ;;  %1955 = vmatprep.mubr.f32.mxu0 %v3008_v12 }
 0x835   : > { %2890 = vrot.lane.b32.xlu0 %v2864_v35, %s3005_s16 }
 0x838   : > { %1795 = vrot.lane.b32.xlu1 %v3571_v30, %s3878_s25 }
 0x839   : > { %1781 = vrot.lane.b32.xlu0 %v3568_v25, %s3005_s16 }
 0x83c   : > { %1793 = vrot.lane.b32.xlu1 %v3568_v25, %s3878_s25 }
 0x83d   : > { %1855 = vrot.lane.b32.xlu0 %v1852_v46, %s3007_s21 }
 0x841   : > { %1797 = vrot.lane.b32.xlu0 %v1740_v33, %s3878_s25 }
 0x845   : > { %1879 = vperm.xlu0 %2793, %v779_v47  }
 0x892   : > { %v1746_v34 = vpop.permute.xlu1 %1745  ;;  %v1758_v45 = vpop.permute.xlu0 %1757 }
 0x896   : > { %v1770_v48 = vpop.permute.xlu1 %1769 }
 0x897   : > { %v2866_v43 = vpop.permute.xlu0 %2865 }
 0x898   : > { %v2868_v49 = vunpack.i.h.bf16 %v2866_v43  ;;  %v2867_v51 = vunpack.i.l.bf16 %v2866_v43 }
 0x89a   : > { %v2871_v52 = vpop.permute.xlu1 %2870  ;;  %v1752_v58 = vsel %vm483_vm8, %v2867_v51, %v2868_v49  ;;  %v1751_v61 = vsel %vm483_vm8, %v1746_v34, %v2867_v51 }
 0x89b   : > { %v2873_v53 = vunpack.i.h.bf16 %v2871_v52  ;;  %v2872_v54 = vunpack.i.l.bf16 %v2871_v52  ;;  %v2876_v55 = vpop.permute.xlu0 %2875  ;;  %v1756_v4 = vsel %vm3170_vm4, %v1752_v58, 0.0  ;;  %v1755_v5 = vsel %vm3174_vm5, %v1751_v61, 0.0 }
 0x89c   : > { %v2878_v56 = vunpack.i.h.bf16 %v2876_v55  ;;  %v2877_v57 = vunpack.i.l.bf16 %v2876_v55  ;;  %v1821_v13 = vrot.slane %v1756_v4, 4  ;;  %v1820_v17 = vrot.slane %v1755_v5, 4 }
 0x89d   : > { %v1764_v50 = vsel %vm496_vm7, %v2872_v54, %v2873_v53  ;;  %v1763_v62 = vsel %vm496_vm7, %v1758_v45, %v2872_v54 }
 0x89e   : > { %v1776_v59 = vsel %vm3889_vm10, %v2877_v57, %v2878_v56  ;;  %v1809_v60 = vpop.permute.xlu1 %1808  ;;  %v1768_v63 = vsel %vm3166_vm3, %v1764_v50, 0.0  ;;  %v1767_v6 = vsel %vm3162_vm2, %v1763_v62, 0.0  ;;  %v1775_v9 = vsel %vm3890_vm9, %v1770_v48, %v2877_v57 }
 0x89f   : > { %v2881_v0 = vpop.permute.xlu0 %2880  ;;  %v1780_v1 = vsel %vm3170_vm4, %v1776_v59, 0.0  ;;  %v1827_v7 = vrot.slane %v1768_v63, 6  ;;  %v1826_v18 = vrot.slane %v1767_v6, 6  ;;  %v1779_v21 = vsel %vm3174_vm5, %v1775_v9, 0.0  ;;  %v774_v6 = vld [vmem:[%s3853_s3 + $0x18] sm:$0x3f] }
 0x8a0   : > { %v2883_v2 = vunpack.i.h.bf16 %v2881_v0  ;;  %v2882_v3 = vunpack.i.l.bf16 %v2881_v0  ;;  %v1843_v10 = vrot.slane %v1780_v1, 2  ;;  %vm3892_vm10 = vcmask 1039360  }
 0x8a1   : > { %vm3893_vm9 = vmmov %vm3892_vm10  ;;  %v1870_v33 = vsel %vm919_vm15, %v1821_v13, %v1827_v7  ;;  %v1842_v40 = vrot.slane %v1779_v21, 2  ;;  %v1869_v53 = vsel %vm919_vm15, %v1820_v17, %v1826_v18 }
 0x8a2   : > { %v1831_v8 = vpop.permute.xlu1 %1830  ;;  %v1837_v14 = vsel %vm3891_vm11, %v2882_v3, %v2883_v2 }
 0x8a3   : > { %v2886_v11 = vpop.permute.xlu0 %2885  ;;  %v1836_v35 = vsel %vm3891_vm11, %v1831_v8, %v2882_v3  ;;  %v1872_v38 = vsel %vm691_vm14, %v1837_v14, %v1843_v10 }
 0x8a4   : > { %v2888_v15 = vunpack.i.h.bf16 %v2886_v11  ;;  %v2887_v16 = vunpack.i.l.bf16 %v2886_v11  ;;  %v1871_v34 = vsel %vm691_vm14, %v1836_v35, %v1842_v40  ;;  %v2634_v49 = vpack.c.bf16 %v1872_v38, %v1870_v33  ;;  %v780_v38 = vld [vmem:[%s3854_s4 + $0x20] sm:$0x3f] }
 0x8a5   : > { %v2636_v56 = vpack.c.bf16 %v1871_v34, %v1869_v53 }
 0x8a6   : > { %v1814_v22 = vsel %vm3892_vm10, %v1809_v60, %v2887_v16  ;;  %v1815_v23 = vsel %vm3893_vm9, %v2887_v16, %v2888_v15  ;;  %v2896_v27 = vpop.permute.xlu1 %2895  ;;  %vm3894_vm10 = vcmask 777216  }
 0x8a7   : > { %v2891_v37 = vpop.permute.xlu0 %2890  ;;  %v1866_v41 = vsel %vm691_vm14, %v1742_v19, %v1815_v23  ;;  %v1868_v30 = vsel %vm376_vm1, %v1815_v23, %v1821_v13  ;;  %v1865_v39 = vsel %vm691_vm14, %v1741_v20, %v1814_v22  ;;  %v2898_v36 = vunpack.i.h.bf16 %v2896_v27  ;;  %vm3895_vm9 = vmmov %vm3894_vm10 }
 0x8a8   : > { %v2893_v25 = vunpack.i.h.bf16 %v2891_v37  ;;  %v2892_v24 = vunpack.i.l.bf16 %v2891_v37  ;;  %v2630_v29 = vpack.c.bf16 %v1868_v30, %v1866_v41  ;;  %v2897_v42 = vunpack.i.l.bf16 %v2896_v27 }
 0x8a9   : > { %v1867_v44 = vsel %vm376_vm1, %v1814_v22, %v1820_v17 }
 0x8aa   : > { %v1788_v46 = vsel %vm522_vm6, %v2892_v24, %v2893_v25  ;;  %2631 = vmatprep.subr.bf16.mxu0 %v2630_v29  ;;  %v2632_v47 = vpack.c.bf16 %v1867_v44, %v1865_v39  ;;  %v1796_v48 = vpop.permute.xlu1 %1795  ;;  %v1862_v54 = vsel %vm3894_vm10, %v2897_v42, %v2898_v36  ;;  %v2935_v25 = vld [vmem:[%s3855_s5] sm:$0xf] }
 0x8ab   : > { %v1792_v45 = vsel %vm3166_vm3, %v1788_v46, 0.0  ;;  %v1782_v43 = vpop.permute.xlu0 %1781  ;;  %v364_v29 = vld [vmem:[%s3856_s6] sm:$0xf] }
 0x8ac   : > { %v1849_v51 = vrot.slane %v1792_v45, 4  ;;  %v1787_v52 = vsel %vm522_vm6, %v1782_v43, %v2892_v24  ;;  %2633 = vmatpush1.bf16.msra.mxu0 %v2632_v47  ;;  %v2366_v24 = vld [vmem:[%s3858_s8] sm:$0xff] }
 0x8ad   : > { %v1791_v55 = vsel %vm3162_vm2, %v1787_v52, 0.0  ;;  %2635 = vmatprep.subr.bf16.mxu0 %v2634_v49 }
 0x8ae   : > { %v1848_v57 = vrot.slane %v1791_v55, 4  ;;  %v1874_v50 = vsel %vm376_vm1, %v1843_v10, %v1849_v51  ;;  %v1876_v58 = vsel %vm919_vm15, %v1849_v51, %v1862_v54  ;;  %v1794_v63 = vpop.permute.xlu1 %1793 }
 0x8af   : > { %v1856_v59 = vpop.permute.xlu0 %1855  ;;  %v2638_v60 = vpack.c.bf16 %v1876_v58, %v1874_v50  ;;  %v1799_v3 = vsel %vm535_vm13, %v1794_v63, %v1796_v48 }
 0x8b0   : > { %v1861_v61 = vsel %vm3895_vm9, %v1856_v59, %v2897_v42  ;;  %v1873_v62 = vsel %vm376_vm1, %v1842_v40, %v1848_v57  ;;  %2637 = vmatpush1.bf16.msra.mxu0 %v2636_v56  ;;  %v1803_v7 = vsel %vm3174_vm5, %v1799_v3, 0.0 }
 0x8b1   : > { %v1875_v0 = vsel %vm919_vm15, %v1848_v57, %v1861_v61  ;;  %2639 = vmatprep.subr.bf16.mxu0 %v2638_v60 }
 0x8b2   : > { %v2640_v1 = vpack.c.bf16 %v1875_v0, %v1873_v62 }
 0x8b3   : > { %v1798_v2 = vpop.permute.xlu0 %1797 }
 0x8b4   : > { %v1800_v4 = vsel %vm535_vm13, %v1796_v48, %v1798_v2  ;;  %2641 = vmatpush1.bf16.msra.mxu0 %v2640_v1 }
 0x8b5   : > { %v1804_v5 = vsel %vm3170_vm4, %v1800_v4, 0.0 }
 0x8b6   : > { %2564 = vmatprep.subr.msk.mxu0 %vm691_vm14, %v1804_v5 }
 0x8b8   : > { %2565 = vmatpush1.msk.msra.mxu0 %vm691_vm14, %v1803_v7 }
 0x8b9   : > { %2566 = vmatmul.mubr.msk.f32.vlgmr.msra.gmra.mrb[4].mxu0 %vm933_vm12, %v774_v6 }
 0x8ba   : > { %2038 = vmatprep.mubr.f32.mxu0 %v3008_v12 }
 0x8c4   : > { %v1880_v8 = vpop.permute.xlu0 %1879 }
 0x98c   : > { %v1957_v9 = vpop.f32.mrb[4].mxu0 }
 0x98d   : > { %v1958_v10 = vadd.f32 %v1957_v9, %v1880_v8  ;;  %v1959_v11 = vpop.f32.mrb[5].mxu0 }
 0x98e   : > { %v1960_v13 = vadd.f32 %v1959_v11, %v1880_v8 }
 0x98f   : > { %v1962_v14 = vmax.f32 %v1958_v10, 0.0 }
 0x990   : > { %v1963_v15 = vmax.f32 %v1960_v13, 0.0 }
 0x991   : > { %2047 = vrot.lane.b32.xlu1 %v1962_v14, %s3000_s26 }
 0x992   : > { %2049 = vrot.lane.b32.xlu0 %v1963_v15, %s3000_s26  ;;  %2567 = vmatprep.subr.msk.mxu0 %vm691_vm14, %v1963_v15 }
 0x993   : > { %2568 = vmatpush1.msk.msra.mxu0 %vm691_vm14, %v1962_v14 }
 0xa03   : > { %v2048_v16 = vpop.permute.xlu1 %2047 }
 0xa04   : > { %v3683_v17 = vsel %vm458_vm0, 0.0, %v2048_v16  ;;  %v2050_v18 = vpop.permute.xlu0 %2049 }
 0xa05   : > { %v3686_v19 = vsel %vm458_vm0, %v2048_v16, %v2050_v18  ;;  %v2056_v20 = vsel %vm458_vm0, %v2050_v18, 0.0  ;;  %2073 = vrot.lane.b32.xlu1 %v3683_v17, %s3001_s27  ;;  %2061 = vrot.lane.b32.xlu0 %v3683_v17, %s3002_s28  ;;  %v2121_v27 = vrot.slane %v3683_v17, 2  ;;  %v2168_v41 = vrot.slane %v3683_v17, 6 }
 0xa06   : > { %v2899_v21 = vpack.i.bf16 %v2056_v20, %v3686_v19  ;;  %v2122_v22 = vrot.slane %v3686_v19, 2  ;;  %v2123_v23 = vrot.slane %v2056_v20, 2  ;;  %v2169_v35 = vrot.slane %v3686_v19, 6 }
 0xa07   : > { %v2170_v37 = vrot.slane %v2056_v20, 6  ;;  %vm3896_vm0 = vcmask 900096   ;;  %v2058_v10 = vsel %vm3166_vm3, %v3686_v19, 0.0  ;;  %v2057_v15 = vsel %vm3162_vm2, %v3683_v17, 0.0 }
 0xa08   : > { %v2924_v33 = vpack.i.bf16 %v2123_v23, %v2122_v22  ;;  %vm3897_vm11 = vmmov %vm3896_vm0 }
 0xa09   : > { %2085 = vrot.lane.b32.xlu0 %v3683_v17, %s3003_s29  ;;  %2900 = vrot.lane.b32.xlu1 %v2899_v21, %s3002_s28  ;;  %v2929_v30 = vpack.i.bf16 %v2170_v37, %v2169_v35 }
 0xa0d   : > { %2905 = vrot.lane.b32.xlu0 %v2899_v21, %s3001_s27  ;;  %2910 = vrot.lane.b32.xlu1 %v2899_v21, %s3003_s29  ;;  %s323_s27 = sand.u32 1, %s2990_s10   ;;  %s2585_s29 = sshll.u32 %s3087_s13, 8 }
 0xa0e   : > { %s2534_s28 = sshll.u32 %s323_s27, 4  ;;  %s3808_s23 = scalar_lea.hbm %s3859_s9, %s2585_s29 }
 0xa0f   : > { %s3015_s13 = smov [#allocation2]  }
 0xa10   : > { %s2940_s22 = sshll.u32 %s3015_s13, 4  ;;  %s2941_s22 = int_to_ptr.vmem [resolvable:$false] %s2940_s22 }
 0xa11   : > { %2920 = vrot.lane.b32.xlu0 %v2899_v21, %s3005_s16  ;;  %2915 = vrot.lane.b32.xlu1 %v2899_v21, %s3006_s17  ;;  %s2942_s26 = scalar_lea.vmem %s2941_s22, 512 }
 0xa15   : > { %2124 = vrot.lane.b32.xlu0 %v2121_v27, %s3004_s14  ;;  %2925 = vrot.lane.b32.xlu1 %v2924_v33, %s3004_s14  ;;  %s3014_s14 = smov 100  }
 0xa19   : > { %2097 = vrot.lane.b32.xlu0 %v3683_v17, %s3005_s16  ;;  %2146 = vrot.lane.b32.xlu1 %v3683_v17, %s3006_s17 }
 0xa1d   : > { %2171 = vrot.lane.b32.xlu0 %v2168_v41, %s3007_s21  ;;  %2930 = vrot.lane.b32.xlu1 %v2929_v30, %s3007_s21 }
 0xa21   : > { %2113 = vrot.lane.b32.xlu0 %v2056_v20, %s3878_s25  ;;  %2111 = vrot.lane.b32.xlu1 %v3686_v19, %s3878_s25 }
 0xa25   : > { %2195 = vperm.xlu0 %2793, %v780_v38   ;;  %2109 = vrot.lane.b32.xlu1 %v3683_v17, %s3878_s25 }
 0xa29   : > { %2280 = vrot.lane.b32.xlu0 %v2935_v25, %s3878_s25  ;;  %1964 = vrot.lane.b32.xlu1 %v2935_v25, %s3014_s14  ;;  %s325_s14 = scalar_lea.vmem [#allocation2], %s2534_s28  ;;  %s2457_s25 = scalar_lea.sflag [#allocation3], %s323_s27 }
 0xa2a   : > { %s2471_s16 = sshll.u32 %s325_s14, 4  ;;  %s3810_s16 = int_to_ptr.vmem [resolvable:$true] %s2471_s16 }
 0xa2b   : > { %s2936_s24 = scalar_lea.vmem %s3810_s16, 256  ;;  %p2943_p0 = scmp.lt.s32.totalorder %s3810_s16, %s2941_s22 }
 0xa2c   : > { %p2937_p11 = scmp.ne.s32.totalorder %s3810_s16, %s2936_s24  ;;  %p2944_p1 = scmp.lt.s32.totalorder %s2942_s26, %s2936_s24 }
 0xa2d   : > { %2369 = vperm.xlu0 %2793, %v2366_v24   ;;  %367 = vperm.xlu1 %2757, %v364_v29  }
 0xa2e   : > { %p2938_p12 = pnand %p2937_p11, %p3104_p5  ;;  %p2945_p2 = por %p2944_p1, %p2943_p0 }
 0xa30   : > { %p2939_p13 = pneg %p2938_p12 }
 0xa32   : > { %p2946_p3 = pnand %p2945_p2, %p2939_p13 }
 0xa77   : > { %v2074_v39 = vpop.permute.xlu1 %2073  ;;  %v2062_v40 = vpop.permute.xlu0 %2061 }
 0xa7b   : > { %v2086_v36 = vpop.permute.xlu0 %2085  ;;  %v2901_v42 = vpop.permute.xlu1 %2900 }
 0xa7c   : > { %v2903_v44 = vunpack.i.h.bf16 %v2901_v42  ;;  %v2902_v46 = vunpack.i.l.bf16 %v2901_v42 }
 0xa7e   : > { %v2067_v43 = vsel %vm483_vm8, %v2062_v40, %v2902_v46  ;;  %v2068_v49 = vsel %vm483_vm8, %v2902_v46, %v2903_v44  ;;  %vm3899_vm8 = vcmask 1039360  }
 0xa7f   : > { %v2906_v47 = vpop.permute.xlu0 %2905  ;;  %v2911_v34 = vpop.permute.xlu1 %2910  ;;  %v2071_v59 = vsel %vm3174_vm5, %v2067_v43, 0.0  ;;  %v2072_v60 = vsel %vm3170_vm4, %v2068_v49, 0.0  ;;  %vm3900_vm10 = vmmov %vm3899_vm8 }
 0xa80   : > { %v2908_v45 = vunpack.i.h.bf16 %v2906_v47  ;;  %v2907_v48 = vunpack.i.l.bf16 %v2906_v47  ;;  %v2913_v51 = vunpack.i.h.bf16 %v2911_v34  ;;  %v2912_v52 = vunpack.i.l.bf16 %v2911_v34 }
 0xa81   : > { %v2137_v6 = vrot.slane %v2072_v60, 4  ;;  %v2136_v16 = vrot.slane %v2071_v59, 4 }
 0xa82   : > { %v2079_v53 = vsel %vm496_vm7, %v2074_v39, %v2907_v48  ;;  %v2080_v54 = vsel %vm496_vm7, %v2907_v48, %v2908_v45  ;;  %v2091_v56 = vsel %vm3896_vm0, %v2086_v36, %v2912_v52  ;;  %v2092_v57 = vsel %vm3897_vm11, %v2912_v52, %v2913_v51 }
 0xa83   : > { %v2084_v55 = vsel %vm3166_vm3, %v2080_v54, 0.0  ;;  %v2921_v50 = vpop.permute.xlu0 %2920  ;;  %v2916_v58 = vpop.permute.xlu1 %2915  ;;  %v2096_v61 = vsel %vm3170_vm4, %v2092_v57, 0.0  ;;  %v2083_v62 = vsel %vm3162_vm2, %v2079_v53, 0.0  ;;  %v2095_v2 = vsel %vm3174_vm5, %v2091_v56, 0.0 }
 0xa84   : > { %v2143_v63 = vrot.slane %v2084_v55, 6  ;;  %v2923_v0 = vunpack.i.h.bf16 %v2921_v50  ;;  %v2922_v1 = vunpack.i.l.bf16 %v2921_v50  ;;  %v2159_v3 = vrot.slane %v2096_v61, 2 }
 0xa85   : > { %v2918_v4 = vunpack.i.h.bf16 %v2916_v58  ;;  %v2917_v5 = vunpack.i.l.bf16 %v2916_v58  ;;  %vm3898_vm7 = vcmask 908288   ;;  %v2142_v18 = vrot.slane %v2083_v62, 6  ;;  %v775_v62 = vld [vmem:[%s3853_s3 + $0x20] sm:$0x3f] }
 0xa86   : > { %v2104_v7 = vsel %vm522_vm6, %v2922_v1, %v2923_v0  ;;  %v2158_v20 = vrot.slane %v2095_v2, 2  ;;  %v2186_v21 = vsel %vm919_vm15, %v2137_v6, %v2143_v63  ;;  %vm3901_vm9 = vmmov %vm3898_vm7 }
 0xa87   : > { %v2125_v8 = vpop.permute.xlu0 %2124  ;;  %v2926_v9 = vpop.permute.xlu1 %2925  ;;  %v2153_v11 = vsel %vm3898_vm7, %v2917_v5, %v2918_v4  ;;  %v2108_v22 = vsel %vm3166_vm3, %v2104_v7, 0.0  ;;  %v2185_v47 = vsel %vm919_vm15, %v2136_v16, %v2142_v18  ;;  %vm3902_vm3 = vcmask 777216  }
 0xa88   : > { %v2928_v13 = vunpack.i.h.bf16 %v2926_v9  ;;  %v2927_v14 = vunpack.i.l.bf16 %v2926_v9  ;;  %v2188_v27 = vsel %vm691_vm14, %v2153_v11, %v2159_v3  ;;  %v2165_v36 = vrot.slane %v2108_v22, 4 }
 0xa89   : > { %v2646_v40 = vpack.c.bf16 %v2188_v27, %v2186_v21 }
 0xa8a   : > { %v2130_v23 = vsel %vm3899_vm8, %v2125_v8, %v2927_v14  ;;  %v2131_v19 = vsel %vm3900_vm10, %v2927_v14, %v2928_v13  ;;  %v2190_v53 = vsel %vm376_vm1, %v2159_v3, %v2165_v36  ;;  %v2365_v13 = vld [vmem:[%s3857_s7] sm:$0xff] }
 0xa8b   : > { %v2098_v33 = vpop.permute.xlu0 %2097  ;;  %v2147_v35 = vpop.permute.xlu1 %2146  ;;  %v2182_v37 = vsel %vm691_vm14, %v2058_v10, %v2131_v19  ;;  %v2184_v17 = vsel %vm376_vm1, %v2131_v19, %v2137_v6  ;;  %v2181_v41 = vsel %vm691_vm14, %v2057_v15, %v2130_v23  ;;  %v2183_v30 = vsel %vm376_vm1, %v2130_v23, %v2136_v16 }
 0xa8c   : > { %v2103_v38 = vsel %vm522_vm6, %v2098_v33, %v2922_v1  ;;  %v2152_v28 = vsel %vm3901_vm9, %v2147_v35, %v2917_v5  ;;  %v2642_v25 = vpack.c.bf16 %v2184_v17, %v2182_v37  ;;  %v2644_v24 = vpack.c.bf16 %v2183_v30, %v2181_v41  ;;  %vm3903_vm6 = vmmov %vm3902_vm3 }
 0xa8d   : > { %v2107_v29 = vsel %vm3162_vm2, %v2103_v38, 0.0  ;;  %v2187_v39 = vsel %vm691_vm14, %v2152_v28, %v2158_v20  ;;  %vm3904_vm2 = vcmask 48128  }
 0xa8e   : > { %2643 = vmatprep.subr.bf16.mxu1 %v2642_v25  ;;  %v2164_v42 = vrot.slane %v2107_v29, 4  ;;  %v2648_v48 = vpack.c.bf16 %v2187_v39, %v2185_v47 }
 0xa8f   : > { %v2172_v44 = vpop.permute.xlu0 %2171  ;;  %v2931_v46 = vpop.permute.xlu1 %2930  ;;  %2645 = vmatpush1.bf16.msra.mxu1 %v2644_v24 }
 0xa90   : > { %v2933_v34 = vunpack.i.h.bf16 %v2931_v46  ;;  %v2932_v45 = vunpack.i.l.bf16 %v2931_v46  ;;  %2647 = vmatprep.subr.bf16.mxu1 %v2646_v40  ;;  %v2189_v49 = vsel %vm376_vm1, %v2158_v20, %v2164_v42 }
 0xa92   : > { %v2177_v43 = vsel %vm3902_vm3, %v2172_v44, %v2932_v45  ;;  %v2178_v26 = vsel %vm3903_vm6, %v2932_v45, %v2933_v34 }
 0xa93   : > { %v2114_v51 = vpop.permute.xlu0 %2113  ;;  %v2112_v52 = vpop.permute.xlu1 %2111  ;;  %2649 = vmatpush1.bf16.msra.mxu1 %v2648_v48  ;;  %v2192_v54 = vsel %vm919_vm15, %v2165_v36, %v2178_v26  ;;  %v2191_v55 = vsel %vm919_vm15, %v2164_v42, %v2177_v43 }
 0xa94   : > { %v2116_v56 = vsel %vm535_vm13, %v2112_v52, %v2114_v51  ;;  %v2650_v57 = vpack.c.bf16 %v2192_v54, %v2190_v53  ;;  %v2652_v50 = vpack.c.bf16 %v2191_v55, %v2189_v49 }
 0xa95   : > { %v2120_v58 = vsel %vm3170_vm4, %v2116_v56, 0.0  ;;  %vm3905_vm4 = vmmov %vm3904_vm2 }
 0xa96   : > { %2651 = vmatprep.subr.bf16.mxu1 %v2650_v57 }
 0xa97   : > { %v2110_v59 = vpop.permute.xlu1 %2109  ;;  %2653 = vmatpush1.bf16.msra.mxu1 %v2652_v50 }
 0xa98   : > { %v2115_v60 = vsel %vm535_vm13, %v2110_v59, %v2112_v52  ;;  %2570 = vmatprep.subr.msk.mxu1 %vm691_vm14, %v2120_v58 }
 0xa99   : > { %v2119_v61 = vsel %vm3174_vm5, %v2115_v60, 0.0  ;;  %vm3906_vm5 = vcmask 31744  }
 0xa9b   : > { %2571 = vmatpush1.msk.msra.mxu1 %vm691_vm14, %v2119_v61  ;;  %v1965_v63 = vpop.permute.xlu1 %1964 }
 0xa9c   : > { %2572 = vmatmul.mubr.msk.f32.vlgmr.msra.gmra.mrb[6].mxu1 %vm933_vm12, %v775_v62  ;;  %2569 = vmatmul.mubr.msk.f32.vlgmr.msra.gmra.mrb[0].mxu0 %vm3904_vm2, %v1965_v63 }
 0xa9d   : > { %2354 = vmatprep.mubr.f32.mxu0 %v3008_v12  ;;  %2445 = vmatprep.mubr.f32.mxu1 %v3008_v12 }
 0xaa4   : > { %v2196_v31 = vpop.permute.xlu0 %2195 }
 0xaa8   : > { %v2281_v5 = vpop.permute.xlu0 %2280 }
 0xaac   : > { %v368_v6 = vpop.permute.xlu1 %367  ;;  %v2370_v14 = vpop.permute.xlu0 %2369 }
 0xb6f   : > { %v2273_v0 = vpop.f32.mrb[6].mxu1 }
 0xb70   : > { %v2274_v1 = vadd.f32 %v2273_v0, %v2196_v31  ;;  %v2275_v32 = vpop.f32.mrb[7].mxu1 }
 0xb71   : > { %v2276_v2 = vadd.f32 %v2275_v32, %v2196_v31 }
 0xb72   : > { %v2278_v4 = vmax.f32 %v2274_v1, 0.0 }
 0xb73   : > { %v2279_v3 = vmax.f32 %v2276_v2, 0.0 }
 0xb75   : > { %2573 = vmatprep.subr.msk.mxu0 %vm691_vm14, %v2279_v3 }
 0xb76   : > { %2574 = vmatpush1.msk.msra.mxu0 %vm691_vm14, %v2278_v4 }
 0xb77   : > { %2575 = vmatmul.mubr.msk.f32.vlgmr.msra.gmra.mrb[0].mxu0 %vm3905_vm4, %v2281_v5 }
 0xc4a   : > { %v2356_v7 = vpop.f32.mrb[0].mxu0 }
 0xc4b   : > { %v2654_v8 = vadd.f32 %v2356_v7, %v368_v6  ;;  %v2358_v12 = vpop.f32.mrb[1].mxu0 }
 0xc4c   : > { %v2655_v9 = vadd.f32 %v2358_v12, %v368_v6 }
 0xc4d   : > { %v2363_v11 = vmax.f32 %v2654_v8, 0.0 }
 0xc4e   : > { %v2364_v10 = vmax.f32 %v2655_v9, 0.0 }
 0xc50   : > { %2576 = vmatprep.subr.msk.mxu1 %vm376_vm1, %v2364_v10 }
 0xc51   : > { %2577 = vmatpush1.msk.msra.mxu1 %vm376_vm1, %v2363_v11 }
 0xc52   : > { %2578 = vmatmul.mubr.msk.f32.vlgmr.msra.gmra.mrb[8].mxu1 %vm3906_vm5, %v2365_v13 }
 0xd25   : > { %v2447_v15 = vpop.f32.mrb[8].mxu1 }
 0xd26   : > { %v2448_v16 = vadd.f32 %v2447_v15, %v2370_v14  ;;  %v2449_v18 = vpop.f32.mrb[9].mxu1 }
 0xd27   : > { %v2450_v20 = vadd.f32 %v2449_v18, %v2370_v14 }
 0xd28   : > { %v2452_v21 = vmax.f32 %v2448_v16, 0.0 }
 0xd29   : > { %v2453_v22 = vmax.f32 %v2450_v20, 0.0 }
 0xd2a   : > { %2454 = vst [vmem:[%s325_s14] sm:$0xff] %v2452_v21 }
 0xd2b   : > { %2455 = vst [vmem:[%s325_s14 + $0x8] sm:$0xff] %v2453_v22 }
 0xd2c   : > { %2949 = shalt.err (!%p2946_p3)
}
 0xd2d   : > { %s2950_s27 = scalar_lea.hbm %s3808_s23, 256  ;;  %s2954_s14 = scalar_lea.hbm %s3859_s9, 512 }
 0xd2e   : > { %p2951_p4 = scmp.ne.s32.totalorder %s3808_s23, %s2950_s27  ;;  %p2955_p9 = scmp.lt.u32.totalorder %s3808_s23, %s3859_s9 }
 0xd2f   : > { %p2956_p10 = scmp.lt.u32.totalorder %s2954_s14, %s2950_s27  ;;  %p2958_p12 = scmp.lt.u32.totalorder %s2950_s27, %s3808_s23 }
 0xd30   : > { %p2952_p7 = pnand %p2951_p4, %p3104_p5 }
 0xd31   : > { %p2957_p11 = por %p2956_p10, %p2955_p9 }
 0xd32   : > { %p2953_p8 = pneg %p2952_p7 }
 0xd33   : > { %p2959_p13 = por %p2958_p12, %p2957_p11 }
 0xd35   : > { %p2960_p0 = pnand %p2959_p13, %p2953_p8 }
 0xd37   : > { %2963 = shalt.err (!%p2960_p0)
}
 0xd38   : > { %2668 = dma.vmem_to_hbm [thread:$0]  (%p3104_p5), %s3810_s16, 256, %s3808_s23, %s2457_s25  }
 0xd39 PF: > { %p2674_p1 = scmp.ge.s32.totalorder %s2998_s12, 2  ;;  %s2483_s24 = sand.u32 1, %s2986_s30  }
 0xd3a   : > { %s2484_s13 = scalar_lea.sflag [#allocation3], %s2483_s24 }
 0xd3b   : > { %p2671_p2 = pnand %p2674_p1, %p3108_p6 }
 0xd3d   : > { %2981 = dma.done.wait (!%p2671_p2), %s2484_s13, 256  }
 0xd3e   : > { %2983 = vsyncadd (!%p2671_p2), %s2484_s13, 4294967040  ;;  %p19_p3 = scmp.ge.s32.totalorder %s3091_s15, 4   ;;  %s3907_s30 = smov %s2990_s10 }
 0xd3f   : > { %s3908_s10 = smov %s2994_s11  ;;  %s3909_s11 = smov %s3102_s18 }
 0xd40   : > { %s3910_s12 = smov %s3091_s15  ;;  %21 = sbr.rel (!%p19_p3) target bundleno = 3 (0x3), region = 91 }
 0xd47   :  { %2489 = vsyncpa [#allocation3], 1 }
 0xd48   :  { %2491 = vsyncpa [#allocation3 + $0x1], 1 }

</bundles_post_ra>
